<compile_context>
chip_gen: v5e
topology: v5e:2x2
jax: 0.10.0
libtpu: 0.0.40
codegen_flags: <defaults>
</compile_context>

<pallas_src>
import functools

import jax
import jax.numpy as jnp
from jax.experimental import pallas as pl
from jax.experimental.pallas import tpu as pltpu


def _round_up(x, m):
    return ((x + m - 1) // m) * m


# --------------------------------- kernel ------------------------------------------


def _mlp_readout_kernel(x_ref, *refs, compute_dtype, precision):
    """Fused (L+1)-layer MLP: relu(linear) x L, then a final linear.

    x_ref holds an f32 row tile; the bf16 cast (when enabled) happens in-register
    so the wrapper never re-materializes x in HBM.
    """
    out_ref = refs[-1]
    p = refs[:-1]                       # [W0, b0, W1, b1, ..., WL, bL]
    n_lin = len(p) // 2

    h = x_ref[...]                      # (tile_rows, D_in) f32
    for l in range(n_lin):
        w = p[2 * l][...]               # (d_in_l, d_out_l), compute_dtype
        b = p[2 * l + 1][...]           # (1, d_out_l), f32
        # MXU matmul with f32 accumulation; bf16 x bf16 on the fast path.
        h = jnp.dot(h.astype(compute_dtype), w,
                    preferred_element_type=jnp.float32,
                    precision=precision) + b
        if l < n_lin - 1:
            h = jnp.maximum(h, 0.0)     # ReLU on the VPU (f32)

    out_ref[...] = h.astype(out_ref.dtype)


# --------------------------------- wrapper -----------------------------------------


def mlp_readout_pallas(x, Ws, bs, *, tile_rows=1024, use_bf16=True):
    """x: [N, input_dim]; Ws[l]: [d_in_l, d_out_l]; bs[l]: [1, d_out_l] (or [d_out_l])."""
    N, D_in = x.shape
    D_out = Ws[-1].shape[1]
    compute_dtype = jnp.bfloat16 if use_bf16 else jnp.float32
    # use_bf16=True is the production path (bf16 MXU inputs, f32 accumulation);
    # use_bf16=False is a verification-only exact-f32 mode.
    precision = None if use_bf16 else jax.lax.Precision.HIGHEST

    # ---- parameter prep (one-time, tiny constant transforms) ----
    Ws = [jnp.asarray(w, jnp.float32) for w in Ws]
    bs = [jnp.reshape(b, (1, -1)).astype(jnp.float32) for b in bs]

    # Lane-dense *hidden* widths: zero-pad each hidden layer's output columns (and
    # the next layer's input rows) to a multiple of 128. Padded columns produce
    # exactly 0 through bias-add/ReLU and padded rows contribute exactly 0 to the
    # next matmul, so the result is bit-identical. The final output is NOT padded.
    for l in range(len(Ws) - 1):
        d_hid = Ws[l].shape[1]
        d_hid_p = _round_up(d_hid, 128)
        if d_hid_p != d_hid:
            pad = d_hid_p - d_hid
            Ws[l] = jnp.pad(Ws[l], ((0, 0), (0, pad)))
            bs[l] = jnp.pad(bs[l], ((0, 0), (0, pad)))
            Ws[l + 1] = jnp.pad(Ws[l + 1], ((0, pad), (0, 0)))

    Ws = [w.astype(compute_dtype) for w in Ws]

    # ---- row tiling: big tiles, but keep >= 2 grid steps so both v7x TCs work ----
    tile_rows = max(8, min(tile_rows, _round_up(pl.cdiv(N, 2), 8)))
    grid = (pl.cdiv(N, tile_rows),)
    # Ragged last tile is handled by Pallas partial-block masking: OOB input rows
    # are unspecified, OOB output rows are discarded. Safe because rows are
    # independent and we never reduce across rows.

    flat = []
    for w, b in zip(Ws, bs):
        flat += [w, b]

    in_specs = [pl.BlockSpec((tile_rows, D_in), lambda i: (i, 0))]   # row tile of x (f32)
    for prm in flat:
        # Full-block parameters: same block every step -> stay resident in VMEM.
        in_specs.append(pl.BlockSpec(prm.shape, lambda i: (0, 0)))

    # Advisory cost estimate (slim f32 output, f32 input, resident params).
    flops = 0
    bytes_accessed = x.size * 4 + N * D_out * 4
    for w, b in zip(Ws, bs):
        flops += 2 * N * w.shape[0] * w.shape[1]
        bytes_accessed += w.size * w.dtype.itemsize + b.size * 4

    kernel = functools.partial(
        _mlp_readout_kernel, compute_dtype=compute_dtype, precision=precision
    )

    out = pl.pallas_call(
        kernel,
        grid=grid,
        in_specs=in_specs,
        out_specs=pl.BlockSpec((tile_rows, D_out), lambda i: (i, 0)),
        out_shape=jax.ShapeDtypeStruct((N, D_out), jnp.float32),
        compiler_params=pltpu.CompilerParams(
            dimension_semantics=("parallel",),
            vmem_limit_bytes=32 * 1024 * 1024,   # fits v5e/v6e/v7x scoped VMEM
        ),
        cost_estimate=pl.CostEstimate(
            flops=flops, transcendentals=0, bytes_accessed=bytes_accessed
        ),
    )(x, *flat)

    return out


# ------------------------- parameter initialization (deterministic) -----------------


def _linear(key, d_in, d_out):
    """PyTorch nn.Linear default init: U(-1/sqrt(fan_in), 1/sqrt(fan_in))."""
    k1, k2 = jax.random.split(key)
    lim = 1.0 / jnp.sqrt(d_in)
    W = jax.random.uniform(k1, (d_in, d_out), minval=-lim, maxval=lim)
    b = jax.random.uniform(k2, (1, d_out), minval=-lim, maxval=lim)
    return W.astype(jnp.float32), b.astype(jnp.float32)


def init_mlp_readout_params(key, input_dim, output_dim, L=2, decreasing_dim=True):
    if decreasing_dim:
        d_ins = [input_dim // 2 ** l for l in range(L + 1)]
        d_outs = [input_dim // 2 ** (l + 1) for l in range(L)] + [output_dim]
    else:
        d_ins = [input_dim] * (L + 1)
        d_outs = [input_dim] * L + [output_dim]
    Ws, bs = [], []
    for di, do in zip(d_ins, d_outs):
        key, sub = jax.random.split(key)
        W, b = _linear(sub, di, do)
        Ws.append(W)
        bs.append(b)
    return Ws, bs


# ------------------------- pure-JAX reference (for verification) --------------------


def reference_forward(x, Ws, bs):
    hi = jax.lax.Precision.HIGHEST
    h = x
    for l in range(len(Ws) - 1):
        h = jnp.maximum(jnp.dot(h, Ws[l], precision=hi) + bs[l], 0.0)
    return jnp.dot(h, Ws[-1], precision=hi) + bs[-1]


if __name__ == "__main__":
    key = jax.random.PRNGKey(0)

    # MLPReadout(input_dim=64, output_dim=1, L=2, decreasing_dim=True)
    #   -> Linear(64,32) + ReLU -> Linear(32,16) + ReLU -> Linear(16,1)
    L = 2
    input_dim, output_dim = 64, 1
    N = 200          # deliberately NOT a multiple of the row tile (exercises ragged masking)

    key, kx, kp = jax.random.split(key, 3)
    x = jax.random.normal(kx, (N, input_dim), dtype=jnp.float32)
    Ws, bs = init_mlp_readout_params(kp, input_dim, output_dim, L=L, decreasing_dim=True)

    ref = reference_forward(x, Ws, bs)

    # Exact-semantics path (f32 matmuls, precision=HIGHEST) — verification only.
    out_fp32 = jax.block_until_ready(mlp_readout_pallas(x, Ws, bs, use_bf16=False))
    assert out_fp32.shape == (N, output_dim)
    assert jnp.allclose(out_fp32, ref, atol=1e-4, rtol=1e-4), \
        "Pallas f32 output mismatch vs reference"

    # Production path (bf16 MXU inputs, f32 accumulation) — looser tolerance as expected.
    out_bf16 = jax.block_until_ready(mlp_readout_pallas(x, Ws, bs, use_bf16=True))
    assert out_bf16.shape == (N, output_dim)
    assert jnp.allclose(out_bf16, ref, atol=5e-2, rtol=5e-2), \
        "Pallas bf16 output mismatch vs reference"

    print("KERNEL_OK")
</pallas_src>

<mosaic_0001>
module attributes {stable_mosaic.version = 11 : i64} {
  func.func @_mlp_readout_kernel(%arg0: i32, %arg1: memref<104x64xf32, #tpu.memory_space<vmem>>, %arg2: memref<64x128xf32, #tpu.memory_space<vmem>>, %arg3: memref<1x128xf32, #tpu.memory_space<vmem>>, %arg4: memref<128x128xf32, #tpu.memory_space<vmem>>, %arg5: memref<1x128xf32, #tpu.memory_space<vmem>>, %arg6: memref<128x1xf32, #tpu.memory_space<vmem>>, %arg7: memref<1x1xf32, #tpu.memory_space<vmem>>, %arg8: memref<104x1xf32, #tpu.memory_space<vmem>>) attributes {dimension_semantics = [#tpu.dimension_semantics<parallel>], iteration_bounds = array<i64: 2>, scalar_prefetch = 0 : i64, scratch_operands = 0 : i64, tpu.core_type = #tpu.core_type<tc>, window_params = [{transform_indices = @transform_0, window_bounds = array<i64: 104, 64>}, {pipeline_mode = #tpu.pipeline_mode<synchronous>, transform_indices = @transform_1, window_bounds = array<i64: 64, 128>}, {pipeline_mode = #tpu.pipeline_mode<synchronous>, transform_indices = @transform_2, window_bounds = array<i64: 1, 128>}, {pipeline_mode = #tpu.pipeline_mode<synchronous>, transform_indices = @transform_3, window_bounds = array<i64: 128, 128>}, {pipeline_mode = #tpu.pipeline_mode<synchronous>, transform_indices = @transform_4, window_bounds = array<i64: 1, 128>}, {pipeline_mode = #tpu.pipeline_mode<synchronous>, transform_indices = @transform_5, window_bounds = array<i64: 128, 1>}, {pipeline_mode = #tpu.pipeline_mode<synchronous>, transform_indices = @transform_6, window_bounds = array<i64: 1, 1>}, {transform_indices = @transform_7, window_bounds = array<i64: 104, 1>}]} {
    %c0 = arith.constant 0 : index
    %c0_0 = arith.constant 0 : index
    %0 = vector.load %arg1[%c0, %c0_0] : memref<104x64xf32, #tpu.memory_space<vmem>>, vector<104x64xf32>
    %c0_1 = arith.constant 0 : index
    %c0_2 = arith.constant 0 : index
    %1 = vector.load %arg2[%c0_1, %c0_2] : memref<64x128xf32, #tpu.memory_space<vmem>>, vector<64x128xf32>
    %c0_3 = arith.constant 0 : index
    %c0_4 = arith.constant 0 : index
    %2 = vector.load %arg3[%c0_3, %c0_4] : memref<1x128xf32, #tpu.memory_space<vmem>>, vector<1x128xf32>
    %cst = arith.constant dense<0.000000e+00> : vector<104x128xf32>
    %3 = tpu.matmul %0, %1, %cst {dimension_numbers = #tpu.dot_dimension_numbers<[1], [0], [0], [1], [0, 0, 1, 1], [], []>, precision = #tpu.contract_precision<fp32>} : vector<104x64xf32>, vector<64x128xf32>, vector<104x128xf32> -> vector<104x128xf32>
    %4 = vector.broadcast %2 : vector<1x128xf32> to vector<104x128xf32>
    %5 = arith.addf %3, %4 : vector<104x128xf32>
    %cst_5 = arith.constant 0.000000e+00 : f32
    %6 = vector.broadcast %cst_5 : f32 to vector<104x128xf32>
    %7 = arith.maximumf %5, %6 : vector<104x128xf32>
    %c0_6 = arith.constant 0 : index
    %c0_7 = arith.constant 0 : index
    %8 = vector.load %arg4[%c0_6, %c0_7] : memref<128x128xf32, #tpu.memory_space<vmem>>, vector<128x128xf32>
    %c0_8 = arith.constant 0 : index
    %c0_9 = arith.constant 0 : index
    %9 = vector.load %arg5[%c0_8, %c0_9] : memref<1x128xf32, #tpu.memory_space<vmem>>, vector<1x128xf32>
    %cst_10 = arith.constant dense<0.000000e+00> : vector<104x128xf32>
    %10 = tpu.matmul %7, %8, %cst_10 {dimension_numbers = #tpu.dot_dimension_numbers<[1], [0], [0], [1], [0, 0, 1, 1], [], []>, precision = #tpu.contract_precision<fp32>} : vector<104x128xf32>, vector<128x128xf32>, vector<104x128xf32> -> vector<104x128xf32>
    %11 = vector.broadcast %9 : vector<1x128xf32> to vector<104x128xf32>
    %12 = arith.addf %10, %11 : vector<104x128xf32>
    %cst_11 = arith.constant 0.000000e+00 : f32
    %13 = vector.broadcast %cst_11 : f32 to vector<104x128xf32>
    %14 = arith.maximumf %12, %13 : vector<104x128xf32>
    %c0_12 = arith.constant 0 : index
    %c0_13 = arith.constant 0 : index
    %15 = vector.load %arg6[%c0_12, %c0_13] : memref<128x1xf32, #tpu.memory_space<vmem>>, vector<128x1xf32>
    %c0_14 = arith.constant 0 : index
    %c0_15 = arith.constant 0 : index
    %16 = vector.load %arg7[%c0_14, %c0_15] : memref<1x1xf32, #tpu.memory_space<vmem>>, vector<1x1xf32>
    %cst_16 = arith.constant dense<0.000000e+00> : vector<104x1xf32>
    %17 = tpu.matmul %14, %15, %cst_16 {dimension_numbers = #tpu.dot_dimension_numbers<[1], [0], [0], [1], [0, 0, 1, 1], [], []>, precision = #tpu.contract_precision<fp32>} : vector<104x128xf32>, vector<128x1xf32>, vector<104x1xf32> -> vector<104x1xf32>
    %18 = vector.broadcast %16 : vector<1x1xf32> to vector<104x1xf32>
    %19 = arith.addf %17, %18 : vector<104x1xf32>
    %c0_17 = arith.constant 0 : index
    %c0_18 = arith.constant 0 : index
    %20 = vector.load %arg8[%c0_17, %c0_18] : memref<104x1xf32, #tpu.memory_space<vmem>>, vector<104x1xf32>
    tpu.vector_store %arg8[%c0_17, %c0_18], %19 {strides = array<i32>} : memref<104x1xf32, #tpu.memory_space<vmem>>, vector<104x1xf32>,
    return
  }
  func.func @transform_0(%arg0: i32) -> (i32, i32) {
    %c0_i32 = arith.constant 0 : i32
    %c0_i32_0 = arith.constant 0 : i32
    return %arg0, %c0_i32 : i32, i32
  }
  func.func @transform_1(%arg0: i32) -> (i32, i32) {
    %c0_i32 = arith.constant 0 : i32
    %c0_i32_0 = arith.constant 0 : i32
    %c0_i32_1 = arith.constant 0 : i32
    return %c0_i32, %c0_i32_0 : i32, i32
  }
  func.func @transform_2(%arg0: i32) -> (i32, i32) {
    %c0_i32 = arith.constant 0 : i32
    %c0_i32_0 = arith.constant 0 : i32
    %c0_i32_1 = arith.constant 0 : i32
    return %c0_i32, %c0_i32_0 : i32, i32
  }
  func.func @transform_3(%arg0: i32) -> (i32, i32) {
    %c0_i32 = arith.constant 0 : i32
    %c0_i32_0 = arith.constant 0 : i32
    %c0_i32_1 = arith.constant 0 : i32
    return %c0_i32, %c0_i32_0 : i32, i32
  }
  func.func @transform_4(%arg0: i32) -> (i32, i32) {
    %c0_i32 = arith.constant 0 : i32
    %c0_i32_0 = arith.constant 0 : i32
    %c0_i32_1 = arith.constant 0 : i32
    return %c0_i32, %c0_i32_0 : i32, i32
  }
  func.func @transform_5(%arg0: i32) -> (i32, i32) {
    %c0_i32 = arith.constant 0 : i32
    %c0_i32_0 = arith.constant 0 : i32
    %c0_i32_1 = arith.constant 0 : i32
    return %c0_i32, %c0_i32_0 : i32, i32
  }
  func.func @transform_6(%arg0: i32) -> (i32, i32) {
    %c0_i32 = arith.constant 0 : i32
    %c0_i32_0 = arith.constant 0 : i32
    %c0_i32_1 = arith.constant 0 : i32
    return %c0_i32, %c0_i32_0 : i32, i32
  }
  func.func @transform_7(%arg0: i32) -> (i32, i32) {
    %c0_i32 = arith.constant 0 : i32
    %c0_i32_0 = arith.constant 0 : i32
    return %arg0, %c0_i32 : i32, i32
  }
}

</mosaic_0001>

<bundles_post_ra>
// kernel: tpu_custom_call.1
= control target key start
LH: loop header
LB: loop body
LE: loop exit
PB: predicated region body
PF: predicated region fallthrough
CT: control target
= control target key end

     0   :  { %s4498_s0 = inlined_call_operand.vmem [shape: f32[200,64], index: 0, kind: input, shape index: {}]   ;;  %s4499_s1 = inlined_call_operand.vmem [shape: f32[64,128], index: 1, kind: input, shape index: {}]   ;;  %s4500_s2 = inlined_call_operand.vmem [shape: f32[1,128], index: 2, kind: input, shape index: {}]   ;;  %s4501_s3 = inlined_call_operand.vmem [shape: f32[128,128], index: 3, kind: input, shape index: {}]   ;;  %s4502_s4 = inlined_call_operand.vmem [shape: f32[1,128], index: 4, kind: input, shape index: {}]   ;;  %s4503_s5 = inlined_call_operand.vmem [shape: f32[128,1], index: 5, kind: input, shape index: {}]   ;;  %s4504_s6 = inlined_call_operand.<no memory space> [shape: f32[1,1], index: 6, kind: input, shape index: {}]   ;;  %s4505_s7 = inlined_call_operand.vmem [shape: f32[200,1], index: 7, kind: output, shape index: {}]  }
   0x1   :  { %v12_v0 = vstv %s4504_s6 }
   0x2   :  { %13 = vst [vmem:[#allocation2] sm:$0x1] %v12_v0 }
   0x3   :  { %s3012_s26 = smov 0   ;;  %s3014_s27 = smov 0  }
   0x4   :  { %s3016_s28 = smov 0  }
   0x5 LB: > { %s3025_s6 = sadd.s32 4294967295, %s2935_s28   ;;  %s3027_s29 = sadd.s32 1, %s2935_s28   ;;  %s2935_s28 = sphi %s3016_s28, %s4554_s28   ;;  %s2931_s27 = sphi %s3014_s27, %s4553_s27   ;;  %s2927_s26 = sphi %s3012_s26, %s4552_s26  }
   0x6   : > { %s175_s30 = ssub.s32 %s2935_s28, %s3027_s29  ;;  %s178_s8 = sadd.s32 1, %s2931_s27 }
   0x7   : > { %p176_p0 = scmp.eq.s32.totalorder %s175_s30, 0  ;;  %p188_p1 = scmp.ne.s32.totalorder %s2931_s27, %s2927_s26 }
   0x8   : > { %p189_p2 = scmp.eq.s32.totalorder %s3025_s6, 1  ;;  %p2751_p3 = scmp.ge.s32.totalorder %s2935_s28, 1 }
   0x9   : > { %s3035_s9 = scalar_select %p176_p0, %s2931_s27, %s178_s8  }
   0xa   : > { %p3037_p4 = por %p189_p2, %p188_p1  ;;  %p248_p5 = scmp.lt.s32.totalorder %s2935_s28, 3 }
   0xc   : > { %p249_p6 = pnand %p2751_p3, %p248_p5 }
   0xe   : > { %252 = sbr.rel (%p249_p6) target bundleno = 886 (0x376), region = 48 }
  0x13   : > { %v322_v1 = vld [vmem:[%s4499_s1 + $0x38] sm:$0xff]  ;;  %v321_v2 = vld [vmem:[%s4499_s1 + $0x30] sm:$0xff]  ;;  %v320_v3 = vld [vmem:[%s4499_s1 + $0x28] sm:$0xff]  ;;  %s3051_s17 = smul.u32 13, %s3025_s6  ;;  %vm327_vm0 = vcmask 523264   ;;  %s280_s15 = sand.u32 1, %s2927_s26  }
  0x14   : > { %v3053_v4 = vand.u32 4294901760, %v322_v1  ;;  %v3055_v5 = vand.u32 4294901760, %v321_v2  ;;  %v3057_v6 = vand.u32 4294901760, %v320_v3  ;;  %v319_v7 = vld [vmem:[%s4499_s1 + $0x20] sm:$0xff]  ;;  %v318_v8 = vld [vmem:[%s4499_s1 + $0x18] sm:$0xff]  ;;  %v317_v9 = vld [vmem:[%s4499_s1 + $0x10] sm:$0xff] }
  0x15   : > { %v3068_v10 = vand.u32 4294901760, %v319_v7  ;;  %v3070_v11 = vand.u32 4294901760, %v318_v8  ;;  %v3072_v12 = vand.u32 4294901760, %v317_v9  ;;  %v316_v13 = vld [vmem:[%s4499_s1 + $0x8] sm:$0xff]  ;;  %v315_v14 = vld [vmem:[%s4499_s1] sm:$0xff]  ;;  %p288_p7 = scmp.lt.s32.totalorder %s3051_s17, 24 }
  0x16   : > { %2766 = vmatpush.msra.mxu2 %v3053_v4  ;;  %376 = vmatpush.msra.mxu0 %v3053_v4  ;;  %v3084_v15 = vsub.f32 %v322_v1, %v3053_v4  ;;  %v3087_v16 = vsub.f32 %v321_v2, %v3055_v5  ;;  %v3090_v17 = vsub.f32 %v320_v3, %v3057_v6  ;;  %v3092_v18 = vand.u32 4294901760, %v316_v13  ;;  %s2782_s16 = smul.u32 104, %s280_s15  ;;  %s2490_s26 = ssub.s32 (%p3037_p4), 25, %s3051_s17 }
  0x17   : > { %v3095_v19 = vsub.f32 %v319_v7, %v3068_v10  ;;  %v3097_v20 = vand.u32 4294901760, %v315_v14  ;;  %v3100_v21 = vsub.f32 %v318_v8, %v3070_v11  ;;  %s289_s8 = scalar_select %p288_p7, %s3051_s17, 24  ;;  %v3104_v22 = vsub.f32 %v317_v9, %v3072_v12 }
  0x18   : > { %2767 = vmatpush.msra.mxu2 %v3055_v5  ;;  %v506_v23 = vand.u32 4294901760, %v3084_v15  ;;  %378 = vmatpush.msra.mxu0 %v3055_v5  ;;  %v512_v24 = vand.u32 4294901760, %v3087_v16  ;;  %v518_v25 = vand.u32 4294901760, %v3090_v17  ;;  %v3114_v28 = vsub.f32 %v316_v13, %v3092_v18  ;;  %s4366_s18 = scalar_lea.vmem [#allocation3], %s2782_s16   ;;  %s2765_s19 = smul.u32 (%p3037_p4), 104, %s3025_s6 }
  0x19   : > { %v524_v26 = vand.u32 4294901760, %v3095_v19  ;;  %v530_v27 = vand.u32 4294901760, %v3100_v21  ;;  %s2752_s11 = sshll.u32 %s289_s8, 3  ;;  %v536_v32 = vand.u32 4294901760, %v3104_v22  ;;  %v3135_v34 = vsub.f32 %v315_v14, %v3097_v20  ;;  %p2491_p8 = scmp.lt.s32.totalorder (%p3037_p4), %s2490_s26, 13 }
  0x1a   : > { %2768 = vmatpush.msra.mxu2 %v3057_v6  ;;  %v507_v29 = vsub.f32 %v3084_v15, %v506_v23  ;;  %v513_v30 = vsub.f32 %v3087_v16, %v512_v24  ;;  %380 = vmatpush.msra.mxu0 %v3057_v6  ;;  %v519_v31 = vsub.f32 %v3090_v17, %v518_v25  ;;  %s3130_s14 = scalar_lea.vmem %s4498_s0, %s2752_s11  ;;  %v542_v44 = vand.u32 4294901760, %v3114_v28  ;;  %s4412_s22 = scalar_lea.vmem (%p3037_p4), %s4505_s7, %s2765_s19  }
  0x1b   : > { %v309_v33 = vld [vmem:[%s3130_s14 + $0x38] sm:$0xff]  ;;  %v302_v35 = vld [vmem:[%s3130_s14] sm:$0xff]  ;;  %v525_v39 = vsub.f32 %v3095_v19, %v524_v26  ;;  %v303_v41 = vld [vmem:[%s3130_s14 + $0x8] sm:$0xff]  ;;  %v531_v42 = vsub.f32 %v3100_v21, %v530_v27  ;;  %v537_v47 = vsub.f32 %v3104_v22, %v536_v32  ;;  %v548_v56 = vand.u32 4294901760, %v3135_v34 }
  0x1c   : > { %v310_v36 = vld [vmem:[%s3130_s14 + $0x40] sm:$0xff]  ;;  %2769 = vmatpush.msra.mxu2 %v3068_v10  ;;  %v508_v37 = vand.u32 4294901760, %v507_v29  ;;  %v514_v38 = vand.u32 4294901760, %v513_v30  ;;  %382 = vmatpush.msra.mxu0 %v3068_v10  ;;  %v350_v40 = vsel %vm327_vm0, %v309_v33, 0  ;;  %v311_v45 = vld [vmem:[%s3130_s14 + $0x48] sm:$0xff]  ;;  %v520_v46 = vand.u32 4294901760, %v519_v31 }
  0x1d   : > { %v3149_v43 = vand.u32 4294901760, %v350_v40  ;;  %v329_v48 = vsel %vm327_vm0, %v302_v35, 0  ;;  %v353_v49 = vsel %vm327_vm0, %v310_v36, 0  ;;  %v332_v53 = vsel %vm327_vm0, %v303_v41, 0  ;;  %v304_v54 = vld [vmem:[%s3130_s14 + $0x10] sm:$0xff] }
  0x1e   : > { %2774 = vmatpush.msra.mxu3 %v508_v37  ;;  %2770 = vmatpush.msra.mxu2 %v3070_v11  ;;  %v3163_v51 = vand.u32 4294901760, %v329_v48  ;;  %v3165_v52 = vand.u32 4294901760, %v353_v49  ;;  %v526_v55 = vand.u32 4294901760, %v525_v39  ;;  %v3171_v57 = vand.u32 4294901760, %v332_v53  ;;  %v312_v33 = vld [vmem:[%s3130_s14 + $0x50] sm:$0xff]  ;;  %v305_v39 = vld [vmem:[%s3130_s14 + $0x18] sm:$0xff] }
  0x1f   : > { %509 = vmatpush.msra.mxu1 %v508_v37  ;;  %384 = vmatpush.msra.mxu0 %v3070_v11  ;;  %v3161_v50 = vsub.f32 %v350_v40, %v3149_v43  ;;  %v356_v58 = vsel %vm327_vm0, %v311_v45, 0  ;;  %v532_v62 = vand.u32 4294901760, %v531_v42  ;;  %v543_v63 = vsub.f32 %v3114_v28, %v542_v44 }
  0x20   : > { %2775 = vmatpush.msra.mxu3 %v514_v38  ;;  %2771 = vmatpush.msra.mxu2 %v3072_v12  ;;  %v3177_v60 = vsub.f32 %v329_v48, %v3163_v51  ;;  %v3180_v61 = vsub.f32 %v353_v49, %v3165_v52  ;;  %v3187_v0 = vsub.f32 %v332_v53, %v3171_v57  ;;  %v335_v1 = vsel %vm327_vm0, %v304_v54, 0  ;;  %v313_v54 = vld [vmem:[%s3130_s14 + $0x58] sm:$0xff] }
  0x21   : > { %515 = vmatpush.msra.mxu1 %v514_v38  ;;  %v449_v59 = vand.u32 4294901760, %v3161_v50  ;;  %386 = vmatpush.msra.mxu0 %v3072_v12  ;;  %v3196_v8 = vand.u32 4294901760, %v356_v58  ;;  %v538_v9 = vand.u32 4294901760, %v537_v47  ;;  %v549_v13 = vsub.f32 %v3135_v34, %v548_v56 }
  0x22   : > { %2776 = vmatpush.msra.mxu3 %v520_v46  ;;  %2772 = vmatpush.msra.mxu2 %v3092_v18  ;;  %v393_v3 = vand.u32 4294901760, %v3177_v60  ;;  %v457_v7 = vand.u32 4294901760, %v3180_v61  ;;  %v401_v30 = vand.u32 4294901760, %v3187_v0  ;;  %v3207_v31 = vand.u32 4294901760, %v335_v1 }
  0x23   : > { %521 = vmatpush.msra.mxu1 %v520_v46  ;;  %v450_v2 = vsub.f32 %v3161_v50, %v449_v59  ;;  %388 = vmatpush.msra.mxu0 %v3092_v18  ;;  %v544_v35 = vand.u32 4294901760, %v543_v63  ;;  %v3215_v38 = vsub.f32 %v356_v58, %v3196_v8  ;;  %v550_v40 = vand.u32 4294901760, %v549_v13 }
  0x24   : > { %2777 = vmatpush.msra.mxu3 %v526_v55  ;;  %2773 = vmatpush.msra.mxu2 %v3097_v20  ;;  %v394_v29 = vsub.f32 %v3177_v60, %v393_v3  ;;  %v458_v37 = vsub.f32 %v3180_v61, %v457_v7  ;;  %v359_v41 = vsel %vm327_vm0, %v312_v33, 0  ;;  %v402_v42 = vsub.f32 %v3187_v0, %v401_v30 }
  0x25   : > { %527 = vmatpush.msra.mxu1 %v526_v55  ;;  %v451_v14 = vand.u32 4294901760, %v450_v2  ;;  %390 = vmatpush.msra.mxu0 %v3097_v20  ;;  %v3225_v45 = vsub.f32 %v335_v1, %v3207_v31  ;;  %v338_v46 = vsel %vm327_vm0, %v305_v39, 0  ;;  %v3232_v47 = vand.u32 4294901760, %v359_v41  ;;  %v306_v55 = vld [vmem:[%s3130_s14 + $0x20] sm:$0xff] }
  0x26   : > { %615 = vmatpush.msrb.mxu2 %v3084_v15  ;;  %2778 = vmatpush.msra.mxu3 %v532_v62  ;;  %v395_v36 = vand.u32 4294901760, %v394_v29  ;;  %v459_v15 = vand.u32 4294901760, %v458_v37  ;;  %v403_v48 = vand.u32 4294901760, %v402_v42  ;;  %v3237_v53 = vand.u32 4294901760, %v338_v46 }
  0x27   : > { %452 = vmatmul.f32.vlgmr.msra.gmra.mxu2 %v451_v14  ;;  %533 = vmatpush.msra.mxu1 %v532_v62  ;;  %v409_v49 = vand.u32 4294901760, %v3225_v45  ;;  %v362_v58 = vsel %vm327_vm0, %v313_v54, 0  ;;  %vm2468_vm1 = vcmask 7168  }
  0x28   : > { %2779 = vmatpush.msra.mxu3 %v538_v9  ;;  %817 = vmatpush.msrb.mxu0 %v506_v23  ;;  %v465_v23 = vand.u32 4294901760, %v3215_v38  ;;  %v3259_v62 = vsub.f32 %v338_v46, %v3237_v53 }
  0x29   : > { %539 = vmatpush.msra.mxu1 %v538_v9  ;;  %396 = vmatmul.f32.vlgmr.msra.gmra.mxu0 %v395_v36  ;;  %v314_v9 = vld [vmem:[%s3130_s14 + $0x60] sm:$0xff] }
  0x2a   : > { %2780 = vmatpush.msra.mxu3 %v544_v35  ;;  %618 = vmatpush.msrb.mxu2 %v3087_v16  ;;  %v466_v16 = vsub.f32 %v3215_v38, %v465_v23  ;;  %v417_v2 = vand.u32 4294901760, %v3259_v62  ;;  %v365_v13 = vsel %vm327_vm0, %v314_v9, 0 }
  0x2b   : > { %545 = vmatpush.msra.mxu1 %v544_v35  ;;  %821 = vmatpush.msrb.mxu0 %v512_v24  ;;  %v3247_v24 = vsub.f32 %v359_v41, %v3232_v47  ;;  %v3304_v35 = vand.u32 4294901760, %v365_v13 }
  0x2c   : > { %2781 = vmatpush.msra.mxu3 %v550_v40  ;;  %621 = vmatpush.msrb.mxu2 %v3090_v17  ;;  %v341_v17 = vsel %vm327_vm0, %v306_v55, 0  ;;  %v418_v14 = vsub.f32 %v3259_v62, %v417_v2 }
  0x2d   : > { %581 = vmatmul.f32.vlgmr.msra.gmra.mxu3 %v3149_v43  ;;  %551 = vmatpush.msra.mxu1 %v550_v40  ;;  %v473_v63 = vand.u32 4294901760, %v3247_v24 }
  0x2e   : > { %712 = vmatpush.msrb.mxu3 %v3053_v4  ;;  %553 = vmatmul.f32.vlgmr.msra.gmra.mxu1 %v3163_v51 }
  0x2f   : > { %460 = vmatmul.f32.gmra.mxu2 %v459_v15  ;;  %908 = vmatpush.msrb.mxu1 %v3053_v4  ;;  %v410_v4 = vsub.f32 %v3225_v45, %v409_v49 }
  0x30   : > { %714 = vmatpush.msrb.mxu3 %v3055_v5  ;;  %825 = vmatpush.msrb.mxu0 %v518_v25  ;;  %v467_v25 = vand.u32 4294901760, %v466_v16 }
  0x31   : > { %404 = vmatmul.f32.gmra.mxu0 %v403_v48  ;;  %910 = vmatpush.msrb.mxu1 %v3055_v5  ;;  %v3268_v5 = vand.u32 4294901760, %v362_v58  ;;  %v411_v1 = vand.u32 4294901760, %v410_v4 }
  0x32   : > { %716 = vmatpush.msrb.mxu3 %v3057_v6  ;;  %624 = vmatpush.msrb.mxu2 %v3095_v19  ;;  %v474_v19 = vsub.f32 %v3247_v24, %v473_v63 }
  0x33   : > { %912 = vmatpush.msrb.mxu1 %v3057_v6  ;;  %829 = vmatpush.msrb.mxu0 %v524_v26  ;;  %v3275_v6 = vand.u32 4294901760, %v341_v17  ;;  %v3284_v26 = vsub.f32 %v362_v58, %v3268_v5  ;;  %v1004_v58 = vld [vmem:[%s4501_s3 + $0x78] sm:$0xff] }
  0x34   : > { %718 = vmatpush.msrb.mxu3 %v3068_v10  ;;  %627 = vmatpush.msrb.mxu2 %v3100_v21  ;;  %v3371_v4 = vand.u32 4294901760, %v1004_v58 }
  0x35   : > { %585 = vmatmul.f32.gmra.mxu3 %v3165_v52  ;;  %914 = vmatpush.msrb.mxu1 %v3068_v10  ;;  %v307_v10 = vld [vmem:[%s3130_s14 + $0x28] sm:$0xff]  ;;  %v3297_v29 = vsub.f32 %v341_v17, %v3275_v6  ;;  %v481_v33 = vand.u32 4294901760, %v3284_v26 }
  0x36   : > { %557 = vmatmul.f32.gmra.mxu1 %v3171_v57  ;;  %720 = vmatpush.msrb.mxu3 %v3070_v11  ;;  %v344_v21 = vsel %vm327_vm0, %v307_v10, 0 }
  0x37   : > { %468 = vmatmul.f32.gmra.mxu2 %v467_v25  ;;  %833 = vmatpush.msrb.mxu0 %v530_v27  ;;  %v475_v27 = vand.u32 4294901760, %v474_v19  ;;  %v1002_v25 = vld [vmem:[%s4501_s3 + $0x68] sm:$0xff]  ;;  %v1001_v19 = vld [vmem:[%s4501_s3 + $0x60] sm:$0xff] }
  0x38   : > { %630 = vmatpush.msrb.mxu2 %v3104_v22  ;;  %722 = vmatpush.msrb.mxu3 %v3072_v12  ;;  %v425_v22 = vand.u32 4294901760, %v3297_v29  ;;  %v3411_v9 = vand.u32 4294901760, %v1002_v25 }
  0x39   : > { %412 = vmatmul.f32.gmra.mxu0 %v411_v1  ;;  %916 = vmatpush.msrb.mxu1 %v3070_v11  ;;  %v419_v11 = vand.u32 4294901760, %v418_v14 }
  0x3a   : > { %633 = vmatpush.msrb.mxu2 %v3114_v28  ;;  %837 = vmatpush.msrb.mxu0 %v536_v32  ;;  %v3313_v32 = vand.u32 4294901760, %v344_v21  ;;  %v3322_v28 = vsub.f32 %v365_v13, %v3304_v35  ;;  %v3431_v13 = vand.u32 4294901760, %v1001_v19 }
  0x3b   : > { %724 = vmatpush.msrb.mxu3 %v3092_v18  ;;  %918 = vmatpush.msrb.mxu1 %v3072_v12  ;;  %v482_v12 = vsub.f32 %v3284_v26, %v481_v33 }
  0x3c   : > { %636 = vmatpush.msrb.mxu2 %v3135_v34  ;;  %841 = vmatpush.msrb.mxu0 %v542_v44  ;;  %v308_v44 = vld [vmem:[%s3130_s14 + $0x30] sm:$0xff]  ;;  %v3332_v36 = vsub.f32 %v344_v21, %v3313_v32  ;;  %v489_v40 = vand.u32 4294901760, %v3322_v28 }
  0x3d   : > { %589 = vmatmul.f32.gmra.mxu3 %v3196_v8  ;;  %920 = vmatpush.msrb.mxu1 %v3092_v18  ;;  %v426_v18 = vsub.f32 %v3297_v29, %v425_v22  ;;  %v347_v37 = vsel %vm327_vm0, %v308_v44, 0  ;;  %v483_v39 = vand.u32 4294901760, %v482_v12  ;;  %v999_v44 = vld [vmem:[%s4501_s3 + $0x50] sm:$0xff] }
  0x3e   : > { %561 = vmatmul.f32.gmra.mxu1 %v3207_v31  ;;  %726 = vmatpush.msrb.mxu3 %v3097_v20  ;;  %v433_v34 = vand.u32 4294901760, %v3332_v36 }
  0x3f   : > { %476 = vmatmul.f32.gmra.mxu2 %v475_v27  ;;  %845 = vmatpush.msrb.mxu0 %v548_v56  ;;  %v427_v41 = vand.u32 4294901760, %v426_v18  ;;  %v3338_v56 = vand.u32 4294901760, %v347_v37  ;;  %v3469_v18 = vand.u32 4294901760, %v999_v44 }
  0x40   : > { %922 = vmatpush.msrb.mxu1 %v3097_v20  ;;  %v490_v20 = vsub.f32 %v3322_v28, %v489_v40  ;;  %v434_v42 = vsub.f32 %v3332_v36, %v433_v34  ;;  %1010 = vmatpush.msra.mxu2 %v3371_v4 }
  0x41   : > { %420 = vmatmul.f32.gmra.mxu0 %v419_v11  ;;  %v3348_v46 = vsub.f32 %v347_v37, %v3338_v56  ;;  %v3474_v37 = vsub.f32 %v999_v44, %v3469_v18 }
  0x42   : > { %v491_v15 = vand.u32 4294901760, %v490_v20  ;;  %v435_v48 = vand.u32 4294901760, %v434_v42  ;;  %1410 = vmatpush.msra.mxu1 %v3371_v4 }
  0x43   : > { %v441_v54 = vand.u32 4294901760, %v3348_v46 }
  0x45   : > { %593 = vmatmul.f32.gmra.mxu3 %v3232_v47  ;;  %v442_v16 = vsub.f32 %v3348_v46, %v441_v54 }
  0x46   : > { %565 = vmatmul.f32.gmra.mxu1 %v3237_v53 }
  0x47   : > { %484 = vmatmul.f32.gmra.mxu2 %v483_v39  ;;  %v443_v55 = vand.u32 4294901760, %v442_v16  ;;  %v1178_v39 = vand.u32 4294901760, %v3474_v37  ;;  %v996_v16 = vld [vmem:[%s4501_s3 + $0x38] sm:$0xff] }
  0x49   : > { %428 = vmatmul.f32.gmra.mxu0 %v427_v41  ;;  %v998_v41 = vld [vmem:[%s4501_s3 + $0x48] sm:$0xff] }
  0x4d   : > { %597 = vmatmul.f32.gmra.mxu3 %v3268_v5 }
  0x4e   : > { %569 = vmatmul.f32.gmra.mxu1 %v3275_v6 }
  0x4f   : > { %492 = vmatmul.f32.gmra.mxu2 %v491_v15 }
  0x51   : > { %436 = vmatmul.f32.gmra.mxu0 %v435_v48 }
  0x55   : > { %601 = vmatmul.f32.gmra.mxu3 %v3304_v35 }
  0x56   : > { %573 = vmatmul.f32.gmra.mxu1 %v3313_v32 }
  0x57   : > { %639 = vmatmul.f32.vlgmr.msrb.gmra.mxu2 %v3177_v60  ;;  %v3376_v60 = vsub.f32 %v1004_v58, %v3371_v4 }
  0x59   : > { %444 = vmatmul.f32.gmra.mxu0 %v443_v55  ;;  %v3522_v55 = vand.u32 4294901760, %v996_v16 }
  0x5a   : > { %1297 = vmatpush.msra.mxu0 %v3376_v60 }
  0x5d   : > { %730 = vmatmul.f32.vlgmr.msrb.gmra.mxu3 %v393_v3  ;;  %v1003_v3 = vld [vmem:[%s4501_s3 + $0x70] sm:$0xff] }
  0x5e   : > { %577 = vmatmul.f32.gmra.mxu1 %v3338_v56 }
  0x5f   : > { %644 = vmatmul.f32.gmra.mxu2 %v3187_v0 }
  0x61   : > { %847 = vmatmul.f32.vlgmr.msrb.gmra.mxu0 %v3163_v51 }
  0x65   : > { %736 = vmatmul.f32.gmra.mxu3 %v401_v30  ;;  %v3391_v30 = vand.u32 4294901760, %v1003_v3 }
  0x66   : > { %924 = vmatmul.f32.vlgmr.msrb.gmra.mxu1 %v3163_v51  ;;  %v1148_v51 = vand.u32 4294901760, %v3376_v60 }
  0x67   : > { %649 = vmatmul.f32.gmra.mxu2 %v3225_v45  ;;  %1412 = vmatpush.msra.mxu1 %v3391_v30 }
  0x68   : > { %v1149_v0 = vsub.f32 %v3376_v60, %v1148_v51  ;;  %1012 = vmatpush.msra.mxu2 %v3391_v30 }
  0x69   : > { %851 = vmatmul.f32.gmra.mxu0 %v3171_v57  ;;  %1414 = vmatpush.msra.mxu1 %v3411_v9 }
  0x6a   : > { %v1150_v45 = vand.u32 4294901760, %v1149_v0  ;;  %1014 = vmatpush.msra.mxu2 %v3411_v9  ;;  %v995_v0 = vld [vmem:[%s4501_s3 + $0x30] sm:$0xff] }
  0x6b   : > { %1416 = vmatpush.msra.mxu1 %v3431_v13 }
  0x6c   : > { %1151 = vmatpush.msra.mxu3 %v1150_v45  ;;  %1016 = vmatpush.msra.mxu2 %v3431_v13  ;;  %v3544_v45 = vand.u32 4294901760, %v995_v0 }
  0x6d   : > { %742 = vmatmul.f32.gmra.mxu3 %v409_v49  ;;  %v3396_v49 = vsub.f32 %v1003_v3, %v3391_v30 }
  0x6e   : > { %928 = vmatmul.f32.gmra.mxu1 %v3171_v57 }
  0x6f   : > { %654 = vmatmul.f32.gmra.mxu2 %v3259_v62  ;;  %v1154_v57 = vand.u32 4294901760, %v3396_v49  ;;  %1300 = vmatpush.msra.mxu0 %v3396_v49 }
  0x71   : > { %855 = vmatmul.f32.gmra.mxu0 %v3207_v31  ;;  %v1155_v17 = vsub.f32 %v3396_v49, %v1154_v57 }
  0x73   : > { %v1156_v1 = vand.u32 4294901760, %v1155_v17 }
  0x75   : > { %748 = vmatmul.f32.gmra.mxu3 %v417_v2 }
  0x76   : > { %932 = vmatmul.f32.gmra.mxu1 %v3207_v31  ;;  %1157 = vmatpush.msra.mxu3 %v1156_v1  ;;  %v3416_v31 = vsub.f32 %v1002_v25, %v3411_v9 }
  0x77   : > { %659 = vmatmul.f32.gmra.mxu2 %v3297_v29  ;;  %v1000_v29 = vld [vmem:[%s4501_s3 + $0x58] sm:$0xff] }
  0x78   : > { %v1160_v62 = vand.u32 4294901760, %v3416_v31  ;;  %1303 = vmatpush.msra.mxu0 %v3416_v31  ;;  %v3450_v27 = vand.u32 4294901760, %v1000_v29 }
  0x79   : > { %859 = vmatmul.f32.gmra.mxu0 %v3237_v53 }
  0x7a   : > { %v1161_v2 = vsub.f32 %v3416_v31, %v1160_v62  ;;  %1018 = vmatpush.msra.mxu2 %v3450_v27  ;;  %1418 = vmatpush.msra.mxu1 %v3450_v27 }
  0x7c   : > { %v1162_v10 = vand.u32 4294901760, %v1161_v2  ;;  %1420 = vmatpush.msra.mxu1 %v3469_v18  ;;  %1020 = vmatpush.msra.mxu2 %v3469_v18  ;;  %v994_v2 = vld [vmem:[%s4501_s3 + $0x28] sm:$0xff] }
  0x7d   : > { %754 = vmatmul.f32.gmra.mxu3 %v425_v22  ;;  %v3455_v22 = vsub.f32 %v1000_v29, %v3450_v27 }
  0x7e   : > { %936 = vmatmul.f32.gmra.mxu1 %v3237_v53  ;;  %1163 = vmatpush.msra.mxu3 %v1162_v10  ;;  %v3436_v53 = vsub.f32 %v1001_v19, %v3431_v13  ;;  %v3570_v10 = vand.u32 4294901760, %v994_v2 }
  0x7f   : > { %664 = vmatmul.f32.gmra.mxu2 %v3332_v36 }
  0x80   : > { %v1166_v14 = vand.u32 4294901760, %v3436_v53  ;;  %1306 = vmatpush.msra.mxu0 %v3436_v53 }
  0x81   : > { %863 = vmatmul.f32.gmra.mxu0 %v3275_v6 }
  0x82   : > { %v1167_v21 = vsub.f32 %v3436_v53, %v1166_v14  ;;  %1309 = vmatpush.msra.mxu0 %v3455_v22 }
  0x84   : > { %v1168_v11 = vand.u32 4294901760, %v1167_v21  ;;  %1312 = vmatpush.msra.mxu0 %v3474_v37 }
  0x85   : > { %760 = vmatmul.f32.gmra.mxu3 %v433_v34  ;;  %v3487_v34 = vand.u32 4294901760, %v998_v41 }
  0x86   : > { %940 = vmatmul.f32.gmra.mxu1 %v3275_v6  ;;  %1169 = vmatpush.msra.mxu3 %v1168_v11  ;;  %v1172_v6 = vand.u32 4294901760, %v3455_v22  ;;  %v3577_v11 = vsub.f32 %v994_v2, %v3570_v10  ;;  %v990_v2 = vld [vmem:[%s4501_s3 + $0x8] sm:$0xff] }
  0x87   : > { %669 = vmatmul.f32.gmra.mxu2 %v3348_v46  ;;  %v3494_v42 = vsub.f32 %v998_v41, %v3487_v34  ;;  %1422 = vmatpush.msra.mxu1 %v3487_v34 }
  0x88   : > { %v1173_v12 = vsub.f32 %v3455_v22, %v1172_v6  ;;  %1022 = vmatpush.msra.mxu2 %v3487_v34 }
  0x89   : > { %867 = vmatmul.f32.gmra.mxu0 %v3313_v32  ;;  %v1184_v46 = vand.u32 4294901760, %v3494_v42 }
  0x8a   : > { %v1174_v36 = vand.u32 4294901760, %v1173_v12  ;;  %1315 = vmatpush.msra.mxu0 %v3494_v42 }
  0x8c   : > { %1175 = vmatpush.msra.mxu3 %v1174_v36  ;;  %v993_v36 = vld [vmem:[%s4501_s3 + $0x20] sm:$0xff] }
  0x8d   : > { %766 = vmatmul.f32.gmra.mxu3 %v441_v54 }
  0x8e   : > { %944 = vmatmul.f32.gmra.mxu1 %v3313_v32  ;;  %v1179_v32 = vsub.f32 %v3474_v37, %v1178_v39 }
  0x8f   : > { %674 = vmatmul.f32.gmra.mxu2 %v3161_v50  ;;  %v997_v50 = vld [vmem:[%s4501_s3 + $0x40] sm:$0xff] }
  0x90   : > { %v1180_v20 = vand.u32 4294901760, %v1179_v32  ;;  %v3596_v32 = vand.u32 4294901760, %v993_v36 }
  0x91   : > { %871 = vmatmul.f32.gmra.mxu0 %v3338_v56 }
  0x92   : > { %1181 = vmatpush.msra.mxu3 %v1180_v20 }
  0x95   : > { %772 = vmatmul.f32.gmra.mxu3 %v449_v59  ;;  %v1185_v59 = vsub.f32 %v3494_v42, %v1184_v46 }
  0x96   : > { %948 = vmatmul.f32.gmra.mxu1 %v3338_v56  ;;  %v3507_v56 = vand.u32 4294901760, %v997_v50 }
  0x97   : > { %679 = vmatmul.f32.gmra.mxu2 %v3180_v61  ;;  %v1186_v15 = vand.u32 4294901760, %v1185_v59 }
  0x98   : > { %1024 = vmatpush.msra.mxu2 %v3507_v56  ;;  %v3511_v48 = vsub.f32 %v997_v50, %v3507_v56  ;;  %1424 = vmatpush.msra.mxu1 %v3507_v56  ;;  %v3605_v50 = vsub.f32 %v993_v36, %v3596_v32  ;;  %v3648_v36 = vand.u32 4294901760, %v990_v2 }
  0x99   : > { %875 = vmatmul.f32.gmra.mxu0 %v3149_v43  ;;  %1187 = vmatpush.msra.mxu3 %v1186_v15 }
  0x9a   : > { %v1190_v54 = vand.u32 4294901760, %v3511_v48  ;;  %1318 = vmatpush.msra.mxu0 %v3511_v48  ;;  %1026 = vmatpush.msra.mxu2 %v3522_v55  ;;  %v4507_v15 = vand.u32 4294901760, %v3605_v50 }
  0x9b   : > { %1426 = vmatpush.msra.mxu1 %v3522_v55 }
  0x9c   : > { %v1191_v61 = vsub.f32 %v3511_v48, %v1190_v54  ;;  %1028 = vmatpush.msra.mxu2 %v3544_v45 }
  0x9d   : > { %778 = vmatmul.f32.gmra.mxu3 %v457_v7  ;;  %1428 = vmatpush.msra.mxu1 %v3544_v45 }
  0x9e   : > { %952 = vmatmul.f32.gmra.mxu1 %v3149_v43  ;;  %v3531_v43 = vsub.f32 %v996_v16, %v3522_v55  ;;  %v1192_v7 = vand.u32 4294901760, %v1191_v61  ;;  %1030 = vmatpush.msra.mxu2 %v3570_v10 }
  0x9f   : > { %684 = vmatmul.f32.gmra.mxu2 %v3215_v38  ;;  %v3554_v38 = vsub.f32 %v995_v0, %v3544_v45  ;;  %1430 = vmatpush.msra.mxu1 %v3570_v10 }
  0xa0   : > { %v4512_v58 = vand.u32 4294901760, %v3531_v43  ;;  %1321 = vmatpush.msra.mxu0 %v3531_v43  ;;  %1193 = vmatpush.msra.mxu3 %v1192_v7  ;;  %v991_v7 = vld [vmem:[%s4501_s3 + $0x10] sm:$0xff] }
  0xa1   : > { %879 = vmatmul.f32.gmra.mxu0 %v3165_v52  ;;  %1032 = vmatpush.msra.mxu2 %v3596_v32 }
  0xa2   : > { %v1197_v3 = vsub.f32 %v3531_v43, %v4512_v58  ;;  %1324 = vmatpush.msra.mxu0 %v3554_v38  ;;  %1432 = vmatpush.msra.mxu1 %v3596_v32 }
  0xa4   : > { %v1198_v25 = vand.u32 4294901760, %v1197_v3  ;;  %1327 = vmatpush.msra.mxu0 %v3577_v11 }
  0xa5   : > { %784 = vmatmul.f32.gmra.mxu3 %v465_v23 }
  0xa6   : > { %956 = vmatmul.f32.gmra.mxu1 %v3165_v52  ;;  %v3547_v17 = vpop.f32.mrf.mxu0  ;;  %1199 = vmatpush.msra.mxu3 %v1198_v25  ;;  %v4509_v52 = vand.u32 4294901760, %v3554_v38  ;;  %v3633_v25 = vand.u32 4294901760, %v991_v7 }
  0xa7   : > { %689 = vmatmul.f32.gmra.mxu2 %v3247_v24  ;;  %1330 = vmatpush.msra.mxu0 %v3605_v50 }
  0xa8   : > { %v1203_v19 = vsub.f32 %v3554_v38, %v4509_v52 }
  0xa9   : > { %883 = vmatmul.f32.gmra.mxu0 %v3196_v8 }
  0xaa   : > { %v3556_v23 = vpop.f32.mrf.mxu2  ;;  %v1204_v21 = vand.u32 4294901760, %v1203_v19 }
  0xab   : > { %v3558_v1 = vpop.f32.mrf.mxu1 }
  0xac   : > { %1205 = vmatpush.msra.mxu3 %v1204_v21 }
  0xad   : > { %790 = vmatmul.f32.gmra.mxu3 %v473_v63  ;;  %v4508_v63 = vand.u32 4294901760, %v3577_v11 }
  0xae   : > { %960 = vmatmul.f32.gmra.mxu1 %v3196_v8  ;;  %v3573_v29 = vpop.f32.mrf.mxu0 }
  0xaf   : > { %694 = vmatmul.f32.gmra.mxu2 %v3284_v26  ;;  %v1209_v44 = vsub.f32 %v3577_v11, %v4508_v63 }
  0xb0   : > { %v3580_v24 = vpop.f32.mrf.mxu3 }
  0xb1   : > { %887 = vmatmul.f32.gmra.mxu0 %v3232_v47  ;;  %v1210_v41 = vand.u32 4294901760, %v1209_v44  ;;  %v3646_v44 = vsub.f32 %v991_v7, %v3633_v25 }
  0xb2   : > { %v3585_v8 = vpop.f32.mrf.mxu2 }
  0xb3   : > { %v3588_v12 = vpop.f32.mrf.mxu1  ;;  %1211 = vmatpush.msra.mxu3 %v1210_v41  ;;  %v4510_v41 = vand.u32 4294901760, %v3646_v44  ;;  %v4530_v42 = vand.u32 4294901760, %v3646_v44 }
  0xb5   : > { %796 = vmatmul.f32.gmra.mxu3 %v481_v33  ;;  %v1215_v33 = vsub.f32 %v3605_v50, %v4507_v15 }
  0xb6   : > { %964 = vmatmul.f32.gmra.mxu1 %v3232_v47  ;;  %v3601_v20 = vpop.f32.mrf.mxu0  ;;  %v992_v47 = vld [vmem:[%s4501_s3 + $0x18] sm:$0xff] }
  0xb7   : > { %699 = vmatmul.f32.gmra.mxu2 %v3322_v28  ;;  %v3622_v16 = vand.u32 4294901760, %v992_v47  ;;  %v1216_v0 = vand.u32 4294901760, %v1215_v33  ;;  %v989_v28 = vld [vmem:[%s4501_s3] sm:$0xff] }
  0xb8   : > { %v3608_v59 = vpop.f32.mrf.mxu3  ;;  %v3664_v33 = vand.u32 4294901760, %v989_v28 }
  0xb9   : > { %891 = vmatmul.f32.gmra.mxu0 %v3268_v5  ;;  %1034 = vmatpush.msra.mxu2 %v3622_v16  ;;  %v3631_v3 = vsub.f32 %v992_v47, %v3622_v16  ;;  %v3662_v47 = vsub.f32 %v990_v2, %v3648_v36 }
  0xba   : > { %v3617_v26 = vpop.f32.mrf.mxu2  ;;  %1434 = vmatpush.msra.mxu1 %v3622_v16  ;;  %1217 = vmatpush.msra.mxu3 %v1216_v0  ;;  %v3677_v2 = vsub.f32 %v989_v28, %v3664_v33 }
  0xbb   : > { %v3624_v61 = vpop.f32.mrf.mxu1  ;;  %v4506_v21 = vand.u32 4294901760, %v3631_v3  ;;  %1036 = vmatpush.msra.mxu2 %v3633_v25  ;;  %1333 = vmatpush.msra.mxu0 %v3631_v3  ;;  %v4511_v15 = vand.u32 4294901760, %v3662_v47  ;;  %v4529_v37 = vand.u32 4294901760, %v3631_v3 }
  0xbc   : > { %1436 = vmatpush.msra.mxu1 %v3633_v25 }
  0xbd   : > { %802 = vmatmul.f32.gmra.mxu3 %v489_v40  ;;  %1038 = vmatpush.msra.mxu2 %v3648_v36 }
  0xbe   : > { %968 = vmatmul.f32.gmra.mxu1 %v3268_v5  ;;  %v3642_v19 = vpop.f32.mrf.mxu0  ;;  %v1221_v5 = vsub.f32 %v3631_v3, %v4506_v21  ;;  %v1227_v21 = vsub.f32 %v3646_v44, %v4510_v41  ;;  %1336 = vmatpush.msra.mxu0 %v3646_v44  ;;  %v1238_v41 = vand.u32 4294901760, %v3677_v2 }
  0xbf   : > { %1438 = vmatpush.msra.mxu1 %v3648_v36  ;;  %1040 = vmatpush.msra.mxu2 %v3664_v33 }
  0xc0   : > { %v3655_v40 = vpop.f32.mrf.mxu3  ;;  %v1222_v0 = vand.u32 4294901760, %v1221_v5  ;;  %v1228_v52 = vand.u32 4294901760, %v1227_v21  ;;  %v1233_v5 = vsub.f32 %v3662_v47, %v4511_v15  ;;  %1339 = vmatpush.msra.mxu0 %v3662_v47  ;;  %v1239_v21 = vsub.f32 %v3677_v2, %v1238_v41 }
  0xc1   : > { %895 = vmatmul.f32.gmra.mxu0 %v3304_v35  ;;  %1440 = vmatpush.msra.mxu1 %v3664_v33 }
  0xc2   : > { %v3669_v7 = vpop.f32.mrf.mxu2  ;;  %1223 = vmatpush.msra.mxu3 %v1222_v0  ;;  %1523 = vmatpush.msrb.mxu2 %v1148_v51  ;;  %v1234_v0 = vand.u32 4294901760, %v1233_v5  ;;  %v1240_v58 = vand.u32 4294901760, %v1239_v21 }
  0xc3   : > { %v3680_v63 = vpop.f32.mrf.mxu1  ;;  %1342 = vmatpush.msra.mxu0 %v3677_v2 }
  0xc4   : > { %1229 = vmatpush.msra.mxu3 %v1228_v52  ;;  %1527 = vmatpush.msrb.mxu2 %v1154_v57  ;;  %v3732_v57 = vld [vmem:[%s4500_s2] ss:$0 sm:$0xff] }
  0xc5   : > { %v398_v53 = vadd.f32 %v3732_v57, %v3547_v17 }
  0xc6   : > { %972 = vmatmul.f32.gmra.mxu1 %v3304_v35  ;;  %v3692_v28 = vpop.f32.mrf.mxu0  ;;  %1235 = vmatpush.msra.mxu3 %v1234_v0 }
  0xc7   : > { %1531 = vmatpush.msrb.mxu2 %v1160_v62  ;;  %v4526_v62 = vand.u32 4294901760, %v3554_v38 }
  0xc8   : > { %v3698_v15 = vpop.f32.mrf.mxu3  ;;  %1241 = vmatpush.msra.mxu3 %v1240_v58 }
  0xc9   : > { %1535 = vmatpush.msrb.mxu2 %v1166_v14  ;;  %v4527_v14 = vand.u32 4294901760, %v3577_v11 }
  0xca   : > { %v3702_v60 = vpop.f32.mrf.mxu2  ;;  %1638 = vmatpush.msrb.mxu3 %v3371_v4 }
  0xcb   : > { %v3704_v35 = vpop.f32.mrf.mxu1  ;;  %1539 = vmatpush.msrb.mxu2 %v1172_v6  ;;  %v4528_v6 = vand.u32 4294901760, %v3605_v50 }
  0xcc   : > { %1640 = vmatpush.msrb.mxu3 %v3391_v30 }
  0xcd   : > { %1543 = vmatpush.msrb.mxu2 %v1178_v39 }
  0xce   : > { %v3712_v51 = vpop.f32.mrf.mxu0  ;;  %1642 = vmatpush.msrb.mxu3 %v3411_v9  ;;  %v4525_v9 = vand.u32 4294901760, %v3531_v43 }
  0xcf   : > { %1547 = vmatpush.msrb.mxu2 %v1184_v46 }
  0xd0   : > { %v3717_v49 = vpop.f32.mrf.mxu3  ;;  %1644 = vmatpush.msrb.mxu3 %v3431_v13 }
  0xd1   : > { %1551 = vmatpush.msrb.mxu2 %v1190_v54  ;;  %v4531_v54 = vand.u32 4294901760, %v3662_v47 }
  0xd2   : > { %v3722_v4 = vpop.f32.mrf.mxu2  ;;  %1646 = vmatpush.msrb.mxu3 %v3450_v27 }
  0xd3   : > { %v3724_v30 = vpop.f32.mrf.mxu1  ;;  %1555 = vmatpush.msrb.mxu2 %v4525_v9 }
  0xd4   : > { %1648 = vmatpush.msrb.mxu3 %v3469_v18  ;;  %v555_v18 = vadd.f32 %v3558_v1, %v398_v53 }
  0xd5   : > { %1559 = vmatpush.msrb.mxu2 %v4526_v62 }
  0xd6   : > { %v3737_v31 = vpop.f32.mrf.mxu0  ;;  %1650 = vmatpush.msrb.mxu3 %v3487_v34 }
  0xd7   : > { %1563 = vmatpush.msrb.mxu2 %v4527_v14 }
  0xd8   : > { %v3742_v13 = vpop.f32.mrf.mxu3  ;;  %1652 = vmatpush.msrb.mxu3 %v3507_v56  ;;  %v406_v56 = vadd.f32 %v3732_v57, %v3573_v29  ;;  %v414_v29 = vadd.f32 %v3732_v57, %v3601_v20 }
  0xd9   : > { %1567 = vmatpush.msrb.mxu2 %v4528_v6 }
  0xda   : > { %v640_v27 = vpop.f32.mrf.mxu2  ;;  %1654 = vmatpush.msrb.mxu3 %v3522_v55 }
  0xdb   : > { %v3749_v22 = vpop.f32.mrf.mxu1  ;;  %1571 = vmatpush.msrb.mxu2 %v4529_v37  ;;  %v641_v34 = vadd.f32 %v640_v27, %v555_v18 }
  0xdc   : > { %1656 = vmatpush.msrb.mxu3 %v3544_v45  ;;  %v559_v45 = vadd.f32 %v3588_v12, %v406_v56 }
  0xdd   : > { %1575 = vmatpush.msrb.mxu2 %v4530_v42 }
  0xde   : > { %v848_v39 = vpop.f32.mrf.mxu0  ;;  %1658 = vmatpush.msrb.mxu3 %v3570_v10 }
  0xdf   : > { %1579 = vmatpush.msrb.mxu2 %v4531_v54 }
  0xe0   : > { %v731_v46 = vpop.f32.mrf.mxu3  ;;  %1660 = vmatpush.msrb.mxu3 %v3596_v32 }
  0xe1   : > { %v732_v48 = vadd.f32 %v731_v46, %v641_v34  ;;  %1583 = vmatpush.msrb.mxu2 %v1238_v41  ;;  %v430_v46 = vadd.f32 %v3732_v57, %v3692_v28 }
  0xe2   : > { %v645_v55 = vpop.f32.mrf.mxu2  ;;  %1662 = vmatpush.msrb.mxu3 %v3622_v16 }
  0xe3   : > { %v849_v43 = vadd.f32 %v848_v39, %v732_v48  ;;  %v925_v58 = vpop.f32.mrf.mxu1  ;;  %v646_v1 = vadd.f32 %v645_v55, %v559_v45  ;;  %v571_v45 = vadd.f32 %v3704_v35, %v430_v46  ;;  %v454_v46 = vadd.f32 %v3732_v57, %v3556_v23 }
  0xe4   : > { %1664 = vmatpush.msrb.mxu3 %v3633_v25  ;;  %v563_v25 = vadd.f32 %v3624_v61, %v414_v29 }
  0xe5   : > { %v926_v17 = vadd.f32 %v925_v58, %v849_v43 }
  0xe6   : > { %v852_v38 = vpop.f32.mrf.mxu0  ;;  %1666 = vmatpush.msrb.mxu3 %v3648_v36 }
  0xe7   : > { %v976_v52 = vmax.f32 %v926_v17, 0.0 }
  0xe8   : > { %v737_v10 = vpop.f32.mrf.mxu3  ;;  %1668 = vmatpush.msrb.mxu3 %v3664_v33  ;;  %v422_v33 = vadd.f32 %v3732_v57, %v3642_v19 }
  0xe9   : > { %v3772_v11 = vand.u32 4294901760, %v976_v52  ;;  %v738_v32 = vadd.f32 %v737_v10, %v646_v1 }
  0xea   : > { %v650_v50 = vpop.f32.mrf.mxu2  ;;  %v567_v27 = vadd.f32 %v3680_v63, %v422_v33 }
  0xeb   : > { %v1042_v12 = vsub.f32 %v976_v52, %v3772_v11  ;;  %v853_v16 = vadd.f32 %v852_v38, %v738_v32  ;;  %1243 = vmatmul.f32.vlgmr.msra.gmra.mxu3 %v3772_v11  ;;  %v929_v3 = vpop.f32.mrf.mxu1  ;;  %v651_v47 = vadd.f32 %v650_v50, %v563_v25  ;;  %v438_v32 = vadd.f32 %v3732_v57, %v3712_v51 }
  0xed   : > { %v930_v44 = vadd.f32 %v929_v3, %v853_v16  ;;  %1345 = vmatmul.f32.vlgmr.msra.gmra.mxu0 %v1042_v12  ;;  %v1043_v36 = vand.u32 4294901760, %v1042_v12 }
  0xee   : > { %v856_v41 = vpop.f32.mrf.mxu0 }
  0xef   : > { %v977_v20 = vmax.f32 %v930_v44, 0.0  ;;  %1444 = vmatmul.f32.vlgmr.msra.gmra.mxu1 %v1043_v36  ;;  %v1044_v2 = vsub.f32 %v1042_v12, %v1043_v36  ;;  %v575_v36 = vadd.f32 %v3724_v30, %v438_v32 }
  0xf0   : > { %v743_v5 = vpop.f32.mrf.mxu3 }
  0xf1   : > { %v3780_v0 = vand.u32 4294901760, %v977_v20  ;;  %v744_v21 = vadd.f32 %v743_v5, %v651_v47  ;;  %v1045_v9 = vand.u32 4294901760, %v1044_v2 }
  0xf2   : > { %v655_v62 = vpop.f32.mrf.mxu2 }
  0xf3   : > { %v857_v53 = vadd.f32 %v856_v41, %v744_v21  ;;  %1046 = vmatmul.f32.vlgmr.msra.gmra.mxu2 %v1045_v9  ;;  %1247 = vmatmul.f32.gmra.mxu3 %v3780_v0  ;;  %v933_v61 = vpop.f32.mrf.mxu1  ;;  %v1050_v14 = vsub.f32 %v977_v20, %v3780_v0  ;;  %v656_v39 = vadd.f32 %v655_v62, %v567_v27 }
  0xf4   : > { %v446_v21 = vadd.f32 %v3732_v57, %v3737_v31 }
  0xf5   : > { %v934_v6 = vadd.f32 %v933_v61, %v857_v53  ;;  %1350 = vmatmul.f32.gmra.mxu0 %v1050_v14  ;;  %v1051_v18 = vand.u32 4294901760, %v1050_v14 }
  0xf6   : > { %v860_v37 = vpop.f32.mrf.mxu0 }
  0xf7   : > { %v978_v19 = vmax.f32 %v934_v6, 0.0  ;;  %1450 = vmatmul.f32.gmra.mxu1 %v1051_v18  ;;  %v1052_v34 = vsub.f32 %v1050_v14, %v1051_v18  ;;  %v579_v6 = vadd.f32 %v3749_v22, %v446_v21 }
  0xf8   : > { %v749_v42 = vpop.f32.mrf.mxu3 }
  0xf9   : > { %v3787_v56 = vand.u32 4294901760, %v978_v19  ;;  %v750_v48 = vadd.f32 %v749_v42, %v656_v39  ;;  %v1053_v54 = vand.u32 4294901760, %v1052_v34 }
  0xfa   : > { %v660_v55 = vpop.f32.mrf.mxu2 }
  0xfb   : > { %v861_v43 = vadd.f32 %v860_v37, %v750_v48  ;;  %1054 = vmatmul.f32.gmra.mxu2 %v1053_v54  ;;  %1251 = vmatmul.f32.gmra.mxu3 %v3787_v56  ;;  %v937_v63 = vpop.f32.mrf.mxu1  ;;  %v1058_v58 = vsub.f32 %v978_v19, %v3787_v56  ;;  %v661_v52 = vadd.f32 %v660_v55, %v571_v45 }
  0xfc   : > { %v583_v45 = vadd.f32 %v3580_v24, %v454_v46 }
  0xfd   : > { %v938_v17 = vadd.f32 %v937_v63, %v861_v43  ;;  %1355 = vmatmul.f32.gmra.mxu0 %v1058_v58  ;;  %v1059_v38 = vand.u32 4294901760, %v1058_v58 }
  0xfe   : > { %v864_v1 = vpop.f32.mrf.mxu0 }
  0xff   : > { %v979_v28 = vmax.f32 %v938_v17, 0.0  ;;  %1456 = vmatmul.f32.gmra.mxu1 %v1059_v38  ;;  %v1060_v10 = vsub.f32 %v1058_v58, %v1059_v38 }
 0x100   : > { %v755_v29 = vpop.f32.mrf.mxu3 }
 0x101   : > { %v3794_v50 = vand.u32 4294901760, %v979_v28  ;;  %v756_v12 = vadd.f32 %v755_v29, %v661_v52  ;;  %v1061_v16 = vand.u32 4294901760, %v1060_v10  ;;  %v462_v29 = vadd.f32 %v3732_v57, %v3585_v8 }
 0x102   : > { %v665_v3 = vpop.f32.mrf.mxu2 }
 0x103   : > { %v865_v25 = vadd.f32 %v864_v1, %v756_v12  ;;  %1062 = vmatmul.f32.gmra.mxu2 %v1061_v16  ;;  %1255 = vmatmul.f32.gmra.mxu3 %v3794_v50  ;;  %v941_v35 = vpop.f32.mrf.mxu1  ;;  %v1066_v44 = vsub.f32 %v979_v28, %v3794_v50  ;;  %v666_v2 = vadd.f32 %v665_v3, %v575_v36 }
 0x105   : > { %v942_v41 = vadd.f32 %v941_v35, %v865_v25  ;;  %1360 = vmatmul.f32.gmra.mxu0 %v1066_v44  ;;  %v1067_v47 = vand.u32 4294901760, %v1066_v44 }
 0x106   : > { %v868_v20 = vpop.f32.mrf.mxu0 }
 0x107   : > { %v980_v51 = vmax.f32 %v942_v41, 0.0  ;;  %1462 = vmatmul.f32.gmra.mxu1 %v1067_v47  ;;  %v1068_v5 = vsub.f32 %v1066_v44, %v1067_v47  ;;  %v587_v44 = vadd.f32 %v3608_v59, %v462_v29 }
 0x108   : > { %v761_v33 = vpop.f32.mrf.mxu3 }
 0x109   : > { %v3801_v9 = vand.u32 4294901760, %v980_v51  ;;  %v762_v62 = vadd.f32 %v761_v33, %v666_v2  ;;  %v1069_v53 = vand.u32 4294901760, %v1068_v5  ;;  %v470_v5 = vadd.f32 %v3732_v57, %v3617_v26 }
 0x10a   : > { %v670_v61 = vpop.f32.mrf.mxu2 }
 0x10b   : > { %v869_v14 = vadd.f32 %v868_v20, %v762_v62  ;;  %1070 = vmatmul.f32.gmra.mxu2 %v1069_v53  ;;  %1259 = vmatmul.f32.gmra.mxu3 %v3801_v9  ;;  %v945_v30 = vpop.f32.mrf.mxu1  ;;  %v1074_v27 = vsub.f32 %v980_v51, %v3801_v9  ;;  %v671_v19 = vadd.f32 %v670_v61, %v579_v6 }
 0x10d   : > { %v946_v18 = vadd.f32 %v945_v30, %v869_v14  ;;  %1365 = vmatmul.f32.gmra.mxu0 %v1074_v27  ;;  %v1075_v37 = vand.u32 4294901760, %v1074_v27  ;;  %v591_v30 = vadd.f32 %v3655_v40, %v470_v5 }
 0x10e   : > { %v872_v39 = vpop.f32.mrf.mxu0 }
 0x10f   : > { %v981_v31 = vmax.f32 %v946_v18, 0.0  ;;  %1468 = vmatmul.f32.gmra.mxu1 %v1075_v37  ;;  %v1076_v34 = vsub.f32 %v1074_v27, %v1075_v37 }
 0x110   : > { %v767_v42 = vpop.f32.mrf.mxu3 }
 0x111   : > { %v3808_v48 = vand.u32 4294901760, %v981_v31  ;;  %v768_v54 = vadd.f32 %v767_v42, %v671_v19  ;;  %v1077_v55 = vand.u32 4294901760, %v1076_v34 }
 0x112   : > { %v675_v43 = vpop.f32.mrf.mxu2 }
 0x113   : > { %v873_v63 = vadd.f32 %v872_v39, %v768_v54  ;;  %1078 = vmatmul.f32.gmra.mxu2 %v1077_v55  ;;  %1263 = vmatmul.f32.gmra.mxu3 %v3808_v48  ;;  %v949_v22 = vpop.f32.mrf.mxu1  ;;  %v1082_v58 = vsub.f32 %v981_v31, %v3808_v48  ;;  %v676_v52 = vadd.f32 %v675_v43, %v583_v45 }
 0x114   : > { %v478_v31 = vadd.f32 %v3732_v57, %v3669_v7 }
 0x115   : > { %v950_v17 = vadd.f32 %v949_v22, %v873_v63  ;;  %1370 = vmatmul.f32.gmra.mxu0 %v1082_v58  ;;  %v1083_v38 = vand.u32 4294901760, %v1082_v58 }
 0x116   : > { %v876_v1 = vpop.f32.mrf.mxu0  ;;  %v595_v63 = vadd.f32 %v3698_v15, %v478_v31 }
 0x117   : > { %v982_v23 = vmax.f32 %v950_v17, 0.0  ;;  %1474 = vmatmul.f32.gmra.mxu1 %v1083_v38  ;;  %v1084_v28 = vsub.f32 %v1082_v58, %v1083_v38 }
 0x118   : > { %v773_v10 = vpop.f32.mrf.mxu3 }
 0x119   : > { %v3815_v32 = vand.u32 4294901760, %v982_v23  ;;  %v774_v12 = vadd.f32 %v773_v10, %v676_v52  ;;  %v1085_v16 = vand.u32 4294901760, %v1084_v28  ;;  %v486_v52 = vadd.f32 %v3732_v57, %v3702_v60 }
 0x11a   : > { %v680_v3 = vpop.f32.mrf.mxu2 }
 0x11b   : > { %v877_v25 = vadd.f32 %v876_v1, %v774_v12  ;;  %1086 = vmatmul.f32.gmra.mxu2 %v1085_v16  ;;  %1267 = vmatmul.f32.gmra.mxu3 %v3815_v32  ;;  %v953_v24 = vpop.f32.mrf.mxu1  ;;  %v1090_v35 = vsub.f32 %v982_v23, %v3815_v32  ;;  %v681_v20 = vadd.f32 %v680_v3, %v587_v44 }
 0x11c   : > { %v599_v3 = vadd.f32 %v3717_v49, %v486_v52 }
 0x11d   : > { %v954_v36 = vadd.f32 %v953_v24, %v877_v25  ;;  %1375 = vmatmul.f32.gmra.mxu0 %v1090_v35  ;;  %v1091_v41 = vand.u32 4294901760, %v1090_v35 }
 0x11e   : > { %v880_v47 = vpop.f32.mrf.mxu0 }
 0x11f   : > { %v983_v8 = vmax.f32 %v954_v36, 0.0  ;;  %1480 = vmatmul.f32.gmra.mxu1 %v1091_v41  ;;  %v1092_v2 = vsub.f32 %v1090_v35, %v1091_v41 }
 0x120   : > { %v779_v51 = vpop.f32.mrf.mxu3 }
 0x121   : > { %v3822_v33 = vand.u32 4294901760, %v983_v8  ;;  %v780_v21 = vadd.f32 %v779_v51, %v681_v20  ;;  %v1093_v62 = vand.u32 4294901760, %v1092_v2 }
 0x122   : > { %v685_v53 = vpop.f32.mrf.mxu2 }
 0x123   : > { %v881_v61 = vadd.f32 %v880_v47, %v780_v21  ;;  %1094 = vmatmul.f32.gmra.mxu2 %v1093_v62  ;;  %1271 = vmatmul.f32.gmra.mxu3 %v3822_v33  ;;  %v957_v59 = vpop.f32.mrf.mxu1  ;;  %v1098_v14 = vsub.f32 %v983_v8, %v3822_v33  ;;  %v686_v37 = vadd.f32 %v685_v53, %v591_v30 }
 0x124   : > { %v494_v47 = vadd.f32 %v3732_v57, %v3722_v4 }
 0x125   : > { %v958_v27 = vadd.f32 %v957_v59, %v881_v61  ;;  %1380 = vmatmul.f32.gmra.mxu0 %v1098_v14  ;;  %v1099_v6 = vand.u32 4294901760, %v1098_v14 }
 0x126   : > { %v884_v18 = vpop.f32.mrf.mxu0  ;;  %v603_v62 = vadd.f32 %v3742_v13, %v494_v47 }
 0x127   : > { %v984_v26 = vmax.f32 %v958_v27, 0.0  ;;  %1486 = vmatmul.f32.gmra.mxu1 %v1099_v6  ;;  %v1100_v39 = vsub.f32 %v1098_v14, %v1099_v6 }
 0x128   : > { %v785_v19 = vpop.f32.mrf.mxu3 }
 0x129   : > { %v3829_v34 = vand.u32 4294901760, %v984_v26  ;;  %v786_v42 = vadd.f32 %v785_v19, %v686_v37  ;;  %v1101_v46 = vand.u32 4294901760, %v1100_v39 }
 0x12a   : > { %v690_v54 = vpop.f32.mrf.mxu2 }
 0x12b   : > { %v885_v55 = vadd.f32 %v884_v18, %v786_v42  ;;  %1102 = vmatmul.f32.gmra.mxu2 %v1101_v46  ;;  %1275 = vmatmul.f32.gmra.mxu3 %v3829_v34  ;;  %v961_v40 = vpop.f32.mrf.mxu1  ;;  %v1106_v43 = vsub.f32 %v984_v26, %v3829_v34  ;;  %v691_v17 = vadd.f32 %v690_v54, %v595_v63 }
 0x12d   : > { %v962_v22 = vadd.f32 %v961_v40, %v885_v55  ;;  %1385 = vmatmul.f32.gmra.mxu0 %v1106_v43  ;;  %v1107_v58 = vand.u32 4294901760, %v1106_v43 }
 0x12e   : > { %v888_v45 = vpop.f32.mrf.mxu0 }
 0x12f   : > { %v985_v7 = vmax.f32 %v962_v22, 0.0  ;;  %1492 = vmatmul.f32.gmra.mxu1 %v1107_v58  ;;  %v1108_v38 = vsub.f32 %v1106_v43, %v1107_v58  ;;  %v1750_v22 = vld [vmem:[%s4503_s5 + $0x78] sm:$0xff] }
 0x130   : > { %v791_v1 = vpop.f32.mrf.mxu3  ;;  %v3864_v58 = vand.u32 4294901760, %v1750_v22 }
 0x131   : > { %v3836_v23 = vand.u32 4294901760, %v985_v7  ;;  %v792_v28 = vadd.f32 %v791_v1, %v691_v17  ;;  %v1109_v10 = vand.u32 4294901760, %v1108_v38  ;;  %v3888_v1 = vld [vmem:[%s4502_s4] ss:$0 sm:$0xff] }
 0x132   : > { %v695_v29 = vpop.f32.mrf.mxu2  ;;  %1756 = vmatpush.msrb.mxu0 %v3864_v58  ;;  %2156 = vmatpush.msra.mxu3 %v3864_v58 }
 0x133   : > { %v889_v12 = vadd.f32 %v888_v45, %v792_v28  ;;  %1110 = vmatmul.f32.gmra.mxu2 %v1109_v10  ;;  %1279 = vmatmul.f32.gmra.mxu3 %v3836_v23  ;;  %v965_v15 = vpop.f32.mrf.mxu1  ;;  %v1114_v16 = vsub.f32 %v985_v7, %v3836_v23  ;;  %v696_v44 = vadd.f32 %v695_v29, %v599_v3  ;;  %v1748_v28 = vld [vmem:[%s4503_s5 + $0x68] sm:$0xff] }
 0x134   : > { %v3897_v10 = vand.u32 4294901760, %v1748_v28 }
 0x135   : > { %v966_v25 = vadd.f32 %v965_v15, %v889_v12  ;;  %1390 = vmatmul.f32.gmra.mxu0 %v1114_v16  ;;  %v1115_v24 = vand.u32 4294901760, %v1114_v16 }
 0x136   : > { %v892_v35 = vpop.f32.mrf.mxu0 }
 0x137   : > { %v986_v60 = vmax.f32 %v966_v25, 0.0  ;;  %1498 = vmatmul.f32.gmra.mxu1 %v1115_v24  ;;  %v1116_v36 = vsub.f32 %v1114_v16, %v1115_v24  ;;  %v3911_v25 = vsub.f32 %v1748_v28, %v3897_v10 }
 0x138   : > { %v797_v41 = vpop.f32.mrf.mxu3 }
 0x139   : > { %v3843_v20 = vand.u32 4294901760, %v986_v60  ;;  %v798_v8 = vadd.f32 %v797_v41, %v696_v44  ;;  %v1117_v2 = vand.u32 4294901760, %v1116_v36  ;;  %v1747_v44 = vld [vmem:[%s4503_s5 + $0x60] sm:$0xff] }
 0x13a   : > { %v700_v21 = vpop.f32.mrf.mxu2 }
 0x13b   : > { %v893_v51 = vadd.f32 %v892_v35, %v798_v8  ;;  %1118 = vmatmul.f32.gmra.mxu2 %v1117_v2  ;;  %1283 = vmatmul.f32.gmra.mxu3 %v3843_v20  ;;  %v969_v49 = vpop.f32.mrf.mxu1  ;;  %v1122_v5 = vsub.f32 %v986_v60, %v3843_v20  ;;  %v701_v59 = vadd.f32 %v700_v21, %v603_v62  ;;  %v4523_v35 = vand.u32 4294901760, %v3911_v25 }
 0x13c   : > { %v3919_v60 = vand.u32 4294901760, %v1747_v44 }
 0x13d   : > { %v970_v53 = vadd.f32 %v969_v49, %v893_v51  ;;  %1395 = vmatmul.f32.gmra.mxu0 %v1122_v5  ;;  %v1123_v61 = vand.u32 4294901760, %v1122_v5  ;;  %v1907_v36 = vsub.f32 %v3911_v25, %v4523_v35 }
 0x13e   : > { %v896_v30 = vpop.f32.mrf.mxu0 }
 0x13f   : > { %v987_v14 = vmax.f32 %v970_v53, 0.0  ;;  %1504 = vmatmul.f32.gmra.mxu1 %v1123_v61  ;;  %v1124_v4 = vsub.f32 %v1122_v5, %v1123_v61  ;;  %v1908_v2 = vand.u32 4294901760, %v1907_v36  ;;  %v1746_v5 = vld [vmem:[%s4503_s5 + $0x58] sm:$0xff] }
 0x140   : > { %v803_v57 = vpop.f32.mrf.mxu3  ;;  %v3943_v62 = vand.u32 4294901760, %v1746_v5 }
 0x141   : > { %v3848_v27 = vand.u32 4294901760, %v987_v14  ;;  %v804_v6 = vadd.f32 %v803_v57, %v701_v59  ;;  %v1125_v18 = vand.u32 4294901760, %v1124_v4  ;;  %v1745_v57 = vld [vmem:[%s4503_s5 + $0x50] sm:$0xff] }
 0x142   : > { %v3949_v61 = vsub.f32 %v1746_v5, %v3943_v62 }
 0x143   : > { %v897_v37 = vadd.f32 %v896_v30, %v804_v6  ;;  %1126 = vmatmul.f32.gmra.mxu2 %v1125_v18  ;;  %1287 = vmatmul.f32.gmra.mxu3 %v3848_v27  ;;  %v973_v26 = vpop.f32.mrf.mxu1  ;;  %v1130_v13 = vsub.f32 %v987_v14, %v3848_v27  ;;  %v3964_v6 = vand.u32 4294901760, %v1745_v57 }
 0x144   : > { %v4521_v4 = vand.u32 4294901760, %v3949_v61 }
 0x145   : > { %v974_v39 = vadd.f32 %v973_v26, %v897_v37  ;;  %1400 = vmatmul.f32.gmra.mxu0 %v1130_v13  ;;  %v1131_v19 = vand.u32 4294901760, %v1130_v13  ;;  %v3970_v18 = vsub.f32 %v1745_v57, %v3964_v6 }
 0x147   : > { %v988_v31 = vmax.f32 %v974_v39, 0.0  ;;  %1510 = vmatmul.f32.gmra.mxu1 %v1131_v19  ;;  %v1132_v42 = vsub.f32 %v1130_v13, %v1131_v19  ;;  %v4520_v13 = vand.u32 4294901760, %v3970_v18  ;;  %v1744_v39 = vld [vmem:[%s4503_s5 + $0x48] sm:$0xff] }
 0x149   : > { %v3852_v46 = vand.u32 4294901760, %v988_v31  ;;  %v1133_v54 = vand.u32 4294901760, %v1132_v42 }
 0x14b   : > { %1134 = vmatmul.f32.gmra.mxu2 %v1133_v54  ;;  %1291 = vmatmul.f32.gmra.mxu3 %v3852_v46  ;;  %v1138_v55 = vsub.f32 %v988_v31, %v3852_v46  ;;  %v3985_v31 = vand.u32 4294901760, %v1744_v39  ;;  %v1743_v54 = vld [vmem:[%s4503_s5 + $0x40] sm:$0xff] }
 0x14d   : > { %1405 = vmatmul.f32.gmra.mxu0 %v1138_v55  ;;  %v1139_v40 = vand.u32 4294901760, %v1138_v55  ;;  %v3991_v42 = vsub.f32 %v1744_v39, %v3985_v31 }
 0x14f   : > { %1516 = vmatmul.f32.gmra.mxu1 %v1139_v40  ;;  %v1140_v43 = vsub.f32 %v1138_v55, %v1139_v40  ;;  %v3996_v55 = vand.u32 4294901760, %v1743_v54 }
 0x151   : > { %v1141_v63 = vand.u32 4294901760, %v1140_v43 }
 0x153   : > { %1142 = vmatmul.f32.gmra.mxu2 %v1141_v63  ;;  %1670 = vmatmul.f32.vlgmr.msrb.gmra.mxu3 %v3772_v11 }
 0x15b   : > { %1585 = vmatmul.f32.vlgmr.msrb.gmra.mxu2 %v3772_v11  ;;  %1674 = vmatmul.f32.gmra.mxu3 %v3780_v0  ;;  %v3870_v11 = vsub.f32 %v1750_v22, %v3864_v58  ;;  %v4011_v22 = vsub.f32 %v1743_v54, %v3996_v55  ;;  %v1739_v54 = vld [vmem:[%s4503_s5 + $0x20] sm:$0xff] }
 0x15d   : > { %v1894_v45 = vand.u32 4294901760, %v3870_v11  ;;  %2043 = vmatpush.msra.mxu2 %v3870_v11 }
 0x15f   : > { %v1895_v17 = vsub.f32 %v3870_v11, %v1894_v45 }
 0x161   : > { %v1896_v7 = vand.u32 4294901760, %v1895_v17  ;;  %v4517_v17 = vand.u32 4294901760, %v4011_v22 }
 0x163   : > { %1589 = vmatmul.f32.gmra.mxu2 %v3780_v0  ;;  %1678 = vmatmul.f32.gmra.mxu3 %v3787_v56  ;;  %v1937_v28 = vsub.f32 %v4011_v22, %v4517_v17 }
 0x164   : > { %1897 = vmatpush.msrb.mxu1 %v1896_v7 }
 0x16b   : > { %1593 = vmatmul.f32.gmra.mxu2 %v3787_v56  ;;  %1682 = vmatmul.f32.gmra.mxu3 %v3794_v50  ;;  %v1749_v56 = vld [vmem:[%s4503_s5 + $0x70] sm:$0xff] }
 0x16c   : > { %v3881_v38 = vand.u32 4294901760, %v1749_v56 }
 0x16e   : > { %v1244_v0 = vpop.f32.mrf.mxu3  ;;  %1758 = vmatpush.msrb.mxu0 %v3881_v38  ;;  %v3892_v52 = vsub.f32 %v1749_v56, %v3881_v38  ;;  %2158 = vmatpush.msra.mxu3 %v3881_v38  ;;  %v1742_v56 = vld [vmem:[%s4503_s5 + $0x38] sm:$0xff] }
 0x16f   : > { %v4019_v7 = vand.u32 4294901760, %v1742_v56 }
 0x170   : > { %v1900_v12 = vand.u32 4294901760, %v3892_v52  ;;  %2046 = vmatpush.msra.mxu2 %v3892_v52  ;;  %1760 = vmatpush.msrb.mxu0 %v3897_v10 }
 0x171   : > { %2160 = vmatpush.msra.mxu3 %v3897_v10 }
 0x172   : > { %v1901_v16 = vsub.f32 %v3892_v52, %v1900_v12  ;;  %2049 = vmatpush.msra.mxu2 %v3911_v25  ;;  %1762 = vmatpush.msrb.mxu0 %v3919_v60 }
 0x173   : > { %1597 = vmatmul.f32.gmra.mxu2 %v3794_v50  ;;  %1686 = vmatmul.f32.gmra.mxu3 %v3801_v9 }
 0x174   : > { %v1902_v24 = vand.u32 4294901760, %v1901_v16  ;;  %2162 = vmatpush.msra.mxu3 %v3919_v60  ;;  %1764 = vmatpush.msrb.mxu0 %v3943_v62 }
 0x176   : > { %v1047_v50 = vpop.f32.mrf.mxu2  ;;  %v1248_v29 = vpop.f32.mrf.mxu3  ;;  %1903 = vmatpush.msrb.mxu1 %v1902_v24  ;;  %2164 = vmatpush.msra.mxu3 %v3943_v62 }
 0x177   : > { %v1048_v15 = vadd.f32 %v3888_v1, %v1047_v50  ;;  %1766 = vmatpush.msrb.mxu0 %v3964_v6 }
 0x178   : > { %1909 = vmatpush.msrb.mxu1 %v1908_v2  ;;  %2166 = vmatpush.msra.mxu3 %v3964_v6 }
 0x179   : > { %v3908_v3 = vadd.f32 %v1244_v0, %v1048_v15  ;;  %1768 = vmatpush.msrb.mxu0 %v3985_v31  ;;  %v1938_v15 = vand.u32 4294901760, %v1937_v28 }
 0x17a   : > { %2168 = vmatpush.msra.mxu3 %v3985_v31 }
 0x17b   : > { %1601 = vmatmul.f32.gmra.mxu2 %v3801_v9  ;;  %1690 = vmatmul.f32.gmra.mxu3 %v3808_v48  ;;  %v3929_v9 = vsub.f32 %v1747_v44, %v3919_v60  ;;  %v1741_v44 = vld [vmem:[%s4503_s5 + $0x30] sm:$0xff] }
 0x17c   : > { %1770 = vmatpush.msrb.mxu0 %v3996_v55  ;;  %2170 = vmatpush.msra.mxu3 %v3996_v55  ;;  %v4044_v36 = vand.u32 4294901760, %v1741_v44 }
 0x17d   : > { %v4522_v51 = vand.u32 4294901760, %v3929_v9  ;;  %2052 = vmatpush.msra.mxu2 %v3929_v9  ;;  %v4535_v11 = vand.u32 4294901760, %v3929_v9 }
 0x17e   : > { %v1055_v41 = vpop.f32.mrf.mxu2  ;;  %v3925_v47 = vpop.f32.mrf.mxu3  ;;  %1772 = vmatpush.msrb.mxu0 %v4019_v7  ;;  %2172 = vmatpush.msra.mxu3 %v4019_v7 }
 0x17f   : > { %v1056_v8 = vadd.f32 %v3888_v1, %v1055_v41  ;;  %v1913_v21 = vsub.f32 %v3929_v9, %v4522_v51  ;;  %2055 = vmatpush.msra.mxu2 %v3949_v61 }
 0x180   : > { %1774 = vmatpush.msrb.mxu0 %v4044_v36  ;;  %2174 = vmatpush.msra.mxu3 %v4044_v36 }
 0x181   : > { %v3935_v49 = vadd.f32 %v1248_v29, %v1056_v8  ;;  %v1914_v53 = vand.u32 4294901760, %v1913_v21  ;;  %2058 = vmatpush.msra.mxu2 %v3970_v18  ;;  %v4031_v29 = vsub.f32 %v1742_v56, %v4019_v7  ;;  %v4048_v8 = vsub.f32 %v1741_v44, %v4044_v36 }
 0x182   : > { %v4087_v56 = vand.u32 4294901760, %v1739_v54 }
 0x183   : > { %1605 = vmatmul.f32.gmra.mxu2 %v3808_v48  ;;  %1694 = vmatmul.f32.gmra.mxu3 %v3815_v32  ;;  %v1919_v48 = vsub.f32 %v3949_v61, %v4521_v4  ;;  %v4516_v16 = vand.u32 4294901760, %v4031_v29  ;;  %v4514_v21 = vand.u32 4294901760, %v4048_v8  ;;  %v1346_v4 = vpop.f32.mrf.mxu0 }
 0x184   : > { %1915 = vmatpush.msrb.mxu1 %v1914_v53  ;;  %2061 = vmatpush.msra.mxu2 %v3991_v42  ;;  %v1740_v53 = vld [vmem:[%s4503_s5 + $0x28] sm:$0xff]  ;;  %v4093_v28 = vsub.f32 %v1739_v54, %v4087_v56 }
 0x185   : > { %v1920_v30 = vand.u32 4294901760, %v1919_v48  ;;  %v1943_v24 = vsub.f32 %v4031_v29, %v4516_v16  ;;  %v4063_v48 = vand.u32 4294901760, %v1740_v53 }
 0x186   : > { %v3952_v59 = vpop.f32.mrf.mxu2  ;;  %v3954_v14 = vpop.f32.mrf.mxu3  ;;  %2064 = vmatpush.msra.mxu2 %v4011_v22 }
 0x187   : > { %1921 = vmatpush.msrb.mxu1 %v1920_v30  ;;  %v1944_v41 = vand.u32 4294901760, %v1943_v24  ;;  %1776 = vmatpush.msrb.mxu0 %v4063_v48  ;;  %v4069_v30 = vsub.f32 %v1740_v53, %v4063_v48 }
 0x188   : > { %2067 = vmatpush.msra.mxu2 %v4031_v29  ;;  %2176 = vmatpush.msra.mxu3 %v4063_v48 }
 0x189   : > { %1778 = vmatpush.msrb.mxu0 %v4087_v56 }
 0x18a   : > { %2070 = vmatpush.msra.mxu2 %v4048_v8  ;;  %2178 = vmatpush.msra.mxu3 %v4087_v56 }
 0x18b   : > { %1609 = vmatmul.f32.gmra.mxu2 %v3815_v32  ;;  %1698 = vmatmul.f32.gmra.mxu3 %v3822_v33  ;;  %v1925_v32 = vsub.f32 %v3970_v18, %v4520_v13  ;;  %v1351_v52 = vpop.f32.mrf.mxu0 }
 0x18c   : > { %2073 = vmatpush.msra.mxu2 %v4069_v30 }
 0x18d   : > { %v1926_v19 = vand.u32 4294901760, %v1925_v32 }
 0x18e   : > { %v3973_v37 = vpop.f32.mrf.mxu2  ;;  %v3975_v26 = vpop.f32.mrf.mxu3  ;;  %2076 = vmatpush.msra.mxu2 %v4093_v28 }
 0x18f   : > { %1927 = vmatpush.msrb.mxu1 %v1926_v19  ;;  %v4513_v19 = vand.u32 4294901760, %v4069_v30 }
 0x193   : > { %1613 = vmatmul.f32.gmra.mxu2 %v3822_v33  ;;  %1702 = vmatmul.f32.gmra.mxu3 %v3829_v34  ;;  %v4518_v33 = vand.u32 4294901760, %v3991_v42 }
 0x195   : > { %v1931_v63 = vsub.f32 %v3991_v42, %v4518_v33 }
 0x196   : > { %v3999_v40 = vpop.f32.mrf.mxu2  ;;  %v4001_v43 = vpop.f32.mrf.mxu3 }
 0x197   : > { %v1932_v0 = vand.u32 4294901760, %v1931_v63  ;;  %v1738_v63 = vld [vmem:[%s4503_s5 + $0x18] sm:$0xff] }
 0x199   : > { %1933 = vmatpush.msrb.mxu1 %v1932_v0 }
 0x19b   : > { %1617 = vmatmul.f32.gmra.mxu2 %v3829_v34  ;;  %1706 = vmatmul.f32.gmra.mxu3 %v3836_v23 }
 0x19c   : > { %1939 = vmatpush.msrb.mxu1 %v1938_v15  ;;  %v4095_v15 = vand.u32 4294901760, %v1738_v63 }
 0x19e   : > { %v4025_v50 = vpop.f32.mrf.mxu2  ;;  %v4027_v34 = vpop.f32.mrf.mxu3  ;;  %1945 = vmatpush.msrb.mxu1 %v1944_v41  ;;  %v4515_v41 = vand.u32 4294901760, %v4093_v28  ;;  %1780 = vmatpush.msrb.mxu0 %v4095_v15  ;;  %v4113_v53 = vsub.f32 %v1738_v63, %v4095_v15  ;;  %v1735_v63 = vld [vmem:[%s4503_s5] sm:$0xff] }
 0x19f   : > { %2180 = vmatpush.msra.mxu3 %v4095_v15  ;;  %v4139_v16 = vand.u32 4294901760, %v1735_v63 }
 0x1a0   : > { %2079 = vmatpush.msra.mxu2 %v4113_v53 }
 0x1a1   : > { %v1983_v13 = vsub.f32 %v1735_v63, %v4139_v16  ;;  %v1445_v63 = vpop.f32.mrf.mxu1 }
 0x1a3   : > { %1621 = vmatmul.f32.gmra.mxu2 %v3836_v23  ;;  %1710 = vmatmul.f32.gmra.mxu3 %v3843_v20  ;;  %v1949_v23 = vsub.f32 %v4048_v8, %v4514_v21  ;;  %v1984_v35 = vand.u32 4294901760, %v1983_v13 }
 0x1a5   : > { %v1950_v57 = vand.u32 4294901760, %v1949_v23  ;;  %v1961_v23 = vsub.f32 %v4093_v28, %v4515_v41 }
 0x1a6   : > { %v4051_v2 = vpop.f32.mrf.mxu2  ;;  %v4053_v5 = vpop.f32.mrf.mxu3 }
 0x1a7   : > { %1951 = vmatpush.msrb.mxu1 %v1950_v57  ;;  %v1962_v54 = vand.u32 4294901760, %v1961_v23 }
 0x1ab   : > { %1625 = vmatmul.f32.gmra.mxu2 %v3843_v20  ;;  %1714 = vmatmul.f32.gmra.mxu3 %v3848_v27  ;;  %v1955_v20 = vsub.f32 %v4069_v30, %v4513_v19 }
 0x1ad   : > { %v1956_v0 = vand.u32 4294901760, %v1955_v20  ;;  %v1736_v20 = vld [vmem:[%s4503_s5 + $0x8] sm:$0xff] }
 0x1ae   : > { %v4072_v32 = vpop.f32.mrf.mxu2  ;;  %v4074_v39 = vpop.f32.mrf.mxu3  ;;  %v4125_v21 = vand.u32 4294901760, %v1736_v20 }
 0x1af   : > { %1957 = vmatpush.msrb.mxu1 %v1956_v0  ;;  %v4519_v0 = vand.u32 4294901760, %v4113_v53 }
 0x1b0   : > { %v1977_v41 = vsub.f32 %v1736_v20, %v4125_v21 }
 0x1b1   : > { %1963 = vmatpush.msrb.mxu1 %v1962_v54  ;;  %v1967_v23 = vsub.f32 %v4113_v53, %v4519_v0 }
 0x1b2   : > { %v1978_v0 = vand.u32 4294901760, %v1977_v41 }
 0x1b3   : > { %1629 = vmatmul.f32.gmra.mxu2 %v3848_v27  ;;  %1718 = vmatmul.f32.gmra.mxu3 %v3852_v46  ;;  %v1737_v27 = vld [vmem:[%s4503_s5 + $0x10] sm:$0xff]  ;;  %v1968_v54 = vand.u32 4294901760, %v1967_v23 }
 0x1b4   : > { %v4115_v57 = vand.u32 4294901760, %v1737_v27  ;;  %v1979_v51 = vsub.f32 %v1977_v41, %v1978_v0 }
 0x1b5   : > { %1969 = vmatpush.msrb.mxu1 %v1968_v54 }
 0x1b6   : > { %v4098_v24 = vpop.f32.mrf.mxu2  ;;  %v4100_v44 = vpop.f32.mrf.mxu3  ;;  %1782 = vmatpush.msrb.mxu0 %v4115_v57  ;;  %v4123_v19 = vsub.f32 %v1737_v27, %v4115_v57  ;;  %2182 = vmatpush.msra.mxu3 %v4115_v57  ;;  %v1980_v23 = vand.u32 4294901760, %v1979_v51 }
 0x1b7   : > { %4532 = vst [vmem:[#allocation4_spill] sm:$0xff] %v4100_v44  ;;  %v4534_v44 = vand.u32 4294901760, %v3911_v25  ;;  %v4538_v25 = vand.u32 4294901760, %v3991_v42  ;;  %v1451_v51 = vpop.f32.mrf.mxu1 }
 0x1b8   : > { %v1972_v27 = vand.u32 4294901760, %v4123_v19  ;;  %1784 = vmatpush.msrb.mxu0 %v4125_v21  ;;  %2082 = vmatpush.msra.mxu2 %v4123_v19 }
 0x1b9   : > { %2184 = vmatpush.msra.mxu3 %v4125_v21 }
 0x1ba   : > { %v1973_v33 = vsub.f32 %v4123_v19, %v1972_v27  ;;  %1786 = vmatpush.msrb.mxu0 %v4139_v16  ;;  %2085 = vmatpush.msra.mxu2 %v1977_v41  ;;  %v1985_v19 = vsub.f32 %v1983_v13, %v1984_v35 }
 0x1bb   : > { %1633 = vmatmul.f32.gmra.mxu2 %v3852_v46  ;;  %2186 = vmatpush.msra.mxu3 %v4139_v16 }
 0x1bc   : > { %v1974_v20 = vand.u32 4294901760, %v1973_v33  ;;  %2269 = vmatpush.msra.mxu0 %v1894_v45  ;;  %2088 = vmatpush.msra.mxu2 %v1983_v13  ;;  %v4536_v45 = vand.u32 4294901760, %v3949_v61  ;;  %v4539_v61 = vand.u32 4294901760, %v4011_v22 }
 0x1be   : > { %v4143_v46 = vpop.f32.mrf.mxu2  ;;  %v4145_v17 = vpop.f32.mrf.mxu3  ;;  %1975 = vmatpush.msrb.mxu1 %v1974_v20  ;;  %2273 = vmatpush.msra.mxu0 %v1900_v12  ;;  %v4537_v12 = vand.u32 4294901760, %v3970_v18 }
 0x1bf   : > { %4533 = vst [vmem:[#allocation5_spill] sm:$0xff] %v4145_v17  ;;  %v1986_v17 = vand.u32 4294901760, %v1985_v19  ;;  %v1356_v18 = vpop.f32.mrf.mxu0  ;;  %v1457_v22 = vpop.f32.mrf.mxu1 }
 0x1c0   : > { %1981 = vmatpush.msrb.mxu1 %v1980_v23  ;;  %2277 = vmatpush.msra.mxu0 %v4534_v44 }
 0x1c2   : > { %1987 = vmatpush.msrb.mxu1 %v1986_v17  ;;  %2281 = vmatpush.msra.mxu0 %v4535_v11  ;;  %v1347_v17 = vadd.f32 %v1346_v4, %v3908_v3  ;;  %v1064_v3 = vadd.f32 %v3888_v1, %v3952_v59 }
 0x1c4   : > { %2384 = vmatpush.msra.mxu1 %v3864_v58  ;;  %2285 = vmatpush.msra.mxu0 %v4536_v45 }
 0x1c6   : > { %v4157_v54 = vpop.f32.mrf.mxu2  ;;  %v4159_v33 = vpop.f32.mrf.mxu3  ;;  %2386 = vmatpush.msra.mxu1 %v3881_v38  ;;  %2289 = vmatpush.msra.mxu0 %v4537_v12  ;;  %v4540_v38 = vand.u32 4294901760, %v4031_v29 }
 0x1c8   : > { %2388 = vmatpush.msra.mxu1 %v3897_v10  ;;  %2293 = vmatpush.msra.mxu0 %v4538_v25  ;;  %v4541_v10 = vand.u32 4294901760, %v4048_v8  ;;  %v1080_v25 = vadd.f32 %v3888_v1, %v3999_v40 }
 0x1ca   : > { %2390 = vmatpush.msra.mxu1 %v3919_v60  ;;  %2297 = vmatpush.msra.mxu0 %v4539_v61  ;;  %v4542_v60 = vand.u32 4294901760, %v4069_v30 }
 0x1cc   : > { %2392 = vmatpush.msra.mxu1 %v3943_v62  ;;  %2301 = vmatpush.msra.mxu0 %v4540_v38  ;;  %v4543_v62 = vand.u32 4294901760, %v4093_v28 }
 0x1ce   : > { %v4173_v9 = vpop.f32.mrf.mxu2  ;;  %v4175_v58 = vpop.f32.mrf.mxu3  ;;  %2394 = vmatpush.msra.mxu1 %v3964_v6  ;;  %2305 = vmatpush.msra.mxu0 %v4541_v10  ;;  %v4544_v6 = vand.u32 4294901760, %v4113_v53 }
 0x1d0   : > { %2396 = vmatpush.msra.mxu1 %v3985_v31  ;;  %2309 = vmatpush.msra.mxu0 %v4542_v60  ;;  %v1361_v31 = vpop.f32.mrf.mxu0  ;;  %v1261_v60 = vadd.f32 %v3975_v26, %v1080_v25 }
 0x1d2   : > { %2398 = vmatpush.msra.mxu1 %v3996_v55  ;;  %2313 = vmatpush.msra.mxu0 %v4543_v62  ;;  %v1446_v55 = vadd.f32 %v1445_v63, %v1347_v17 }
 0x1d4   : > { %2400 = vmatpush.msra.mxu1 %v4019_v7  ;;  %2317 = vmatpush.msra.mxu0 %v4544_v6  ;;  %v1463_v7 = vpop.f32.mrf.mxu1 }
 0x1d6   : > { %v4189_v13 = vpop.f32.mrf.mxu2  ;;  %v1671_v42 = vpop.f32.mrf.mxu3  ;;  %2402 = vmatpush.msra.mxu1 %v4044_v36  ;;  %2321 = vmatpush.msra.mxu0 %v1972_v27  ;;  %v1352_v36 = vadd.f32 %v1351_v52, %v3935_v49  ;;  %v1072_v49 = vadd.f32 %v3888_v1, %v3973_v37 }
 0x1d8   : > { %2404 = vmatpush.msra.mxu1 %v4063_v48  ;;  %2325 = vmatpush.msra.mxu0 %v1978_v0  ;;  %v1366_v41 = vpop.f32.mrf.mxu0 }
 0x1da   : > { %2406 = vmatpush.msra.mxu1 %v4087_v56  ;;  %2329 = vmatpush.msra.mxu0 %v1984_v35  ;;  %v1253_v56 = vadd.f32 %v3925_v47, %v1064_v3  ;;  %v1452_v35 = vadd.f32 %v1451_v51, %v1352_v36 }
 0x1dc   : > { %2408 = vmatpush.msra.mxu1 %v4095_v15  ;;  %v1357_v47 = vadd.f32 %v1356_v18, %v1253_v56  ;;  %v1469_v0 = vpop.f32.mrf.mxu1 }
 0x1de   : > { %v1586_v29 = vpop.f32.mrf.mxu2  ;;  %v1675_v8 = vpop.f32.mrf.mxu3  ;;  %2410 = vmatpush.msra.mxu1 %v4115_v57  ;;  %v1458_v63 = vadd.f32 %v1457_v22, %v1357_v47 }
 0x1df   : > { %v1587_v30 = vadd.f32 %v1586_v29, %v1446_v55 }
 0x1e0   : > { %2412 = vmatpush.msra.mxu1 %v4125_v21  ;;  %v1371_v12 = vpop.f32.mrf.mxu0 }
 0x1e1   : > { %v1672_v4 = vadd.f32 %v1671_v42, %v1587_v30  ;;  %v1367_v30 = vadd.f32 %v1366_v41, %v1261_v60  ;;  %v1096_v41 = vadd.f32 %v3888_v1, %v4051_v2 }
 0x1e2   : > { %2414 = vmatpush.msra.mxu1 %v4139_v16  ;;  %v1257_v16 = vadd.f32 %v3954_v14, %v1072_v49 }
 0x1e3   : > { %v1722_v48 = vmax.f32 %v1672_v4, 0.0 }
 0x1e4   : > { %v1362_v14 = vadd.f32 %v1361_v31, %v1257_v16  ;;  %v1475_v18 = vpop.f32.mrf.mxu1  ;;  %v1088_v31 = vadd.f32 %v3888_v1, %v4025_v50 }
 0x1e5   : > { %v4207_v28 = vand.u32 4294901760, %v1722_v48 }
 0x1e6   : > { %v1590_v15 = vpop.f32.mrf.mxu2  ;;  %v1679_v44 = vpop.f32.mrf.mxu3  ;;  %v1464_v62 = vadd.f32 %v1463_v7, %v1362_v14  ;;  %v1265_v4 = vadd.f32 %v4001_v43, %v1088_v31 }
 0x1e7   : > { %v1788_v59 = vsub.f32 %v1722_v48, %v4207_v28  ;;  %v1591_v53 = vadd.f32 %v1590_v15, %v1452_v35  ;;  %1989 = vmatmul.f32.vlgmr.msrb.gmra.mxu1 %v4207_v28  ;;  %v1470_v48 = vadd.f32 %v1469_v0, %v1367_v30  ;;  %v1269_v0 = vadd.f32 %v4027_v34, %v1096_v41  ;;  %v4545_v41 = vld [vmem:[#allocation4_spill] sm:$0xff] }
 0x1e8   : > { %v1376_v26 = vpop.f32.mrf.mxu0  ;;  %v1372_v43 = vadd.f32 %v1371_v12, %v1265_v4 }
 0x1e9   : > { %v1789_v57 = vand.u32 4294901760, %v1788_v59  ;;  %v1676_v21 = vadd.f32 %v1675_v8, %v1591_v53  ;;  %2091 = vmatmul.f32.vlgmr.msra.gmra.mxu2 %v1788_v59  ;;  %v1377_v12 = vadd.f32 %v1376_v26, %v1269_v0 }
 0x1eb   : > { %v1790_v27 = vsub.f32 %v1788_v59, %v1789_v57  ;;  %v1723_v20 = vmax.f32 %v1676_v21, 0.0  ;;  %2190 = vmatmul.f32.vlgmr.msra.gmra.mxu3 %v1789_v57 }
 0x1ec   : > { %v1481_v59 = vpop.f32.mrf.mxu1 }
 0x1ed   : > { %v1791_v23 = vand.u32 4294901760, %v1790_v27  ;;  %v4215_v19 = vand.u32 4294901760, %v1723_v20 }
 0x1ee   : > { %v1594_v11 = vpop.f32.mrf.mxu2  ;;  %v1683_v45 = vpop.f32.mrf.mxu3 }
 0x1ef   : > { %v1595_v52 = vadd.f32 %v1594_v11, %v1458_v63  ;;  %1792 = vmatmul.f32.vlgmr.msrb.gmra.mxu0 %v1791_v23  ;;  %1993 = vmatmul.f32.gmra.mxu1 %v4215_v19  ;;  %v1796_v37 = vsub.f32 %v1723_v20, %v4215_v19  ;;  %v1476_v20 = vadd.f32 %v1475_v18, %v1372_v43 }
 0x1f0   : > { %v1381_v47 = vpop.f32.mrf.mxu0 }
 0x1f1   : > { %v1680_v51 = vadd.f32 %v1679_v44, %v1595_v52  ;;  %2096 = vmatmul.f32.gmra.mxu2 %v1796_v37  ;;  %v1797_v61 = vand.u32 4294901760, %v1796_v37 }
 0x1f3   : > { %v1724_v38 = vmax.f32 %v1680_v51, 0.0  ;;  %2196 = vmatmul.f32.gmra.mxu3 %v1797_v61  ;;  %v1798_v10 = vsub.f32 %v1796_v37, %v1797_v61 }
 0x1f4   : > { %v1487_v34 = vpop.f32.mrf.mxu1 }
 0x1f5   : > { %v4222_v42 = vand.u32 4294901760, %v1724_v38  ;;  %v1799_v22 = vand.u32 4294901760, %v1798_v10 }
 0x1f6   : > { %v1598_v6 = vpop.f32.mrf.mxu2  ;;  %v1687_v17 = vpop.f32.mrf.mxu3 }
 0x1f7   : > { %v1599_v55 = vadd.f32 %v1598_v6, %v1464_v62  ;;  %1800 = vmatmul.f32.gmra.mxu0 %v1799_v22  ;;  %1997 = vmatmul.f32.gmra.mxu1 %v4222_v42  ;;  %v1804_v40 = vsub.f32 %v1724_v38, %v4222_v42  ;;  %v1482_v38 = vadd.f32 %v1481_v59, %v1377_v12 }
 0x1f8   : > { %v1386_v22 = vpop.f32.mrf.mxu0  ;;  %v1112_v6 = vadd.f32 %v3888_v1, %v4098_v24 }
 0x1f9   : > { %v1684_v29 = vadd.f32 %v1683_v45, %v1599_v55  ;;  %2101 = vmatmul.f32.gmra.mxu2 %v1804_v40  ;;  %v1805_v8 = vand.u32 4294901760, %v1804_v40  ;;  %v1104_v45 = vadd.f32 %v3888_v1, %v4072_v32 }
 0x1fb   : > { %v1725_v3 = vmax.f32 %v1684_v29, 0.0  ;;  %2202 = vmatmul.f32.gmra.mxu3 %v1805_v8  ;;  %v1806_v7 = vsub.f32 %v1804_v40, %v1805_v8  ;;  %v1273_v61 = vadd.f32 %v4053_v5, %v1104_v45  ;;  %v1277_v8 = vadd.f32 %v4074_v39, %v1112_v6 }
 0x1fc   : > { %v1493_v29 = vpop.f32.mrf.mxu1 }
 0x1fd   : > { %v4229_v36 = vand.u32 4294901760, %v1725_v3  ;;  %v1807_v56 = vand.u32 4294901760, %v1806_v7  ;;  %v1382_v5 = vadd.f32 %v1381_v47, %v1273_v61 }
 0x1fe   : > { %v1602_v35 = vpop.f32.mrf.mxu2  ;;  %v1691_v15 = vpop.f32.mrf.mxu3 }
 0x1ff   : > { %v1603_v44 = vadd.f32 %v1602_v35, %v1470_v48  ;;  %1808 = vmatmul.f32.gmra.mxu0 %v1807_v56  ;;  %2001 = vmatmul.f32.gmra.mxu1 %v4229_v36  ;;  %v1812_v50 = vsub.f32 %v1725_v3, %v4229_v36  ;;  %v1488_v26 = vadd.f32 %v1487_v34, %v1382_v5 }
 0x200   : > { %v1120_v56 = vadd.f32 %v3888_v1, %v4143_v46  ;;  %v1391_v39 = vpop.f32.mrf.mxu0 }
 0x201   : > { %v1688_v53 = vadd.f32 %v1687_v17, %v1603_v44  ;;  %2106 = vmatmul.f32.gmra.mxu2 %v1812_v50  ;;  %v1813_v49 = vand.u32 4294901760, %v1812_v50  ;;  %v1387_v44 = vadd.f32 %v1386_v22, %v1277_v8 }
 0x203   : > { %v1726_v57 = vmax.f32 %v1688_v53, 0.0  ;;  %2208 = vmatmul.f32.gmra.mxu3 %v1813_v49  ;;  %v1814_v21 = vsub.f32 %v1812_v50, %v1813_v49  ;;  %v1281_v53 = vadd.f32 %v4545_v41, %v1120_v56  ;;  %v1494_v43 = vadd.f32 %v1493_v29, %v1387_v44 }
 0x205   : > { %v4236_v27 = vand.u32 4294901760, %v1726_v57  ;;  %v1815_v16 = vand.u32 4294901760, %v1814_v21  ;;  %v1499_v21 = vpop.f32.mrf.mxu1 }
 0x206   : > { %v1606_v23 = vpop.f32.mrf.mxu2  ;;  %v1695_v63 = vpop.f32.mrf.mxu3 }
 0x207   : > { %v1607_v11 = vadd.f32 %v1606_v23, %v1476_v20  ;;  %1816 = vmatmul.f32.gmra.mxu0 %v1815_v16  ;;  %2005 = vmatmul.f32.gmra.mxu1 %v4236_v27  ;;  %v1820_v2 = vsub.f32 %v1726_v57, %v4236_v27  ;;  %v1128_v20 = vadd.f32 %v3888_v1, %v4157_v54 }
 0x209   : > { %v1692_v52 = vadd.f32 %v1691_v15, %v1607_v11  ;;  %2111 = vmatmul.f32.gmra.mxu2 %v1820_v2  ;;  %v1821_v37 = vand.u32 4294901760, %v1820_v2 }
 0x20b   : > { %v1727_v25 = vmax.f32 %v1692_v52, 0.0  ;;  %2214 = vmatmul.f32.gmra.mxu3 %v1821_v37  ;;  %v1822_v51 = vsub.f32 %v1820_v2, %v1821_v37  ;;  %v1396_v52 = vpop.f32.mrf.mxu0  ;;  %v4546_v37 = vld [vmem:[#allocation5_spill] sm:$0xff] }
 0x20c   : > { %v1285_v12 = vadd.f32 %v4546_v37, %v1128_v20 }
 0x20d   : > { %v4243_v14 = vand.u32 4294901760, %v1727_v25  ;;  %v1823_v10 = vand.u32 4294901760, %v1822_v51 }
 0x20e   : > { %v1610_v18 = vpop.f32.mrf.mxu2  ;;  %v1699_v60 = vpop.f32.mrf.mxu3 }
 0x20f   : > { %v1611_v62 = vadd.f32 %v1610_v18, %v1482_v38  ;;  %1824 = vmatmul.f32.gmra.mxu0 %v1823_v10  ;;  %2009 = vmatmul.f32.gmra.mxu1 %v4243_v14  ;;  %v1828_v32 = vsub.f32 %v1727_v25, %v4243_v14  ;;  %v1505_v10 = vpop.f32.mrf.mxu1  ;;  %v1136_v18 = vadd.f32 %v3888_v1, %v4173_v9 }
 0x211   : > { %v1696_v17 = vadd.f32 %v1695_v63, %v1611_v62  ;;  %2116 = vmatmul.f32.gmra.mxu2 %v1828_v32  ;;  %v1829_v55 = vand.u32 4294901760, %v1828_v32  ;;  %v1392_v63 = vadd.f32 %v1391_v39, %v1281_v53 }
 0x213   : > { %v1728_v40 = vmax.f32 %v1696_v17, 0.0  ;;  %2220 = vmatmul.f32.gmra.mxu3 %v1829_v55  ;;  %v1830_v31 = vsub.f32 %v1828_v32, %v1829_v55  ;;  %v1500_v25 = vadd.f32 %v1499_v21, %v1392_v63  ;;  %v1397_v32 = vadd.f32 %v1396_v52, %v1285_v12  ;;  %v1401_v29 = vpop.f32.mrf.mxu0 }
 0x214   : > { %v1289_v55 = vadd.f32 %v4159_v33, %v1136_v18 }
 0x215   : > { %v4250_v30 = vand.u32 4294901760, %v1728_v40  ;;  %v1831_v3 = vand.u32 4294901760, %v1830_v31 }
 0x216   : > { %v1614_v7 = vpop.f32.mrf.mxu2  ;;  %v1703_v48 = vpop.f32.mrf.mxu3 }
 0x217   : > { %v1615_v4 = vadd.f32 %v1614_v7, %v1488_v26  ;;  %1832 = vmatmul.f32.gmra.mxu0 %v1831_v3  ;;  %2013 = vmatmul.f32.gmra.mxu1 %v4250_v30  ;;  %v1836_v24 = vsub.f32 %v1728_v40, %v4250_v30  ;;  %v1506_v40 = vadd.f32 %v1505_v10, %v1397_v32  ;;  %v1511_v33 = vpop.f32.mrf.mxu1 }
 0x218   : > { %v1144_v3 = vadd.f32 %v3888_v1, %v4189_v13 }
 0x219   : > { %v1700_v35 = vadd.f32 %v1699_v60, %v1615_v4  ;;  %2121 = vmatmul.f32.gmra.mxu2 %v1836_v24  ;;  %v1837_v15 = vand.u32 4294901760, %v1836_v24 }
 0x21b   : > { %v1729_v50 = vmax.f32 %v1700_v35, 0.0  ;;  %2226 = vmatmul.f32.gmra.mxu3 %v1837_v15  ;;  %v1838_v59 = vsub.f32 %v1836_v24, %v1837_v15  ;;  %v1402_v24 = vadd.f32 %v1401_v29, %v1289_v55  ;;  %v1293_v35 = vadd.f32 %v4175_v58, %v1144_v3  ;;  %v1406_v13 = vpop.f32.mrf.mxu0 }
 0x21d   : > { %v4257_v49 = vand.u32 4294901760, %v1729_v50  ;;  %v1839_v57 = vand.u32 4294901760, %v1838_v59  ;;  %v1512_v44 = vadd.f32 %v1511_v33, %v1402_v24 }
 0x21e   : > { %v1618_v47 = vpop.f32.mrf.mxu2  ;;  %v1707_v11 = vpop.f32.mrf.mxu3 }
 0x21f   : > { %v1619_v0 = vadd.f32 %v1618_v47, %v1494_v43  ;;  %1840 = vmatmul.f32.gmra.mxu0 %v1839_v57  ;;  %2017 = vmatmul.f32.gmra.mxu1 %v4257_v49  ;;  %v1844_v46 = vsub.f32 %v1729_v50, %v4257_v49  ;;  %v1407_v57 = vadd.f32 %v1406_v13, %v1293_v35  ;;  %v1517_v47 = vpop.f32.mrf.mxu1 }
 0x221   : > { %v1704_v16 = vadd.f32 %v1703_v48, %v1619_v0  ;;  %2126 = vmatmul.f32.gmra.mxu2 %v1844_v46  ;;  %v1845_v23 = vand.u32 4294901760, %v1844_v46 }
 0x223   : > { %v1730_v2 = vmax.f32 %v1704_v16, 0.0  ;;  %2232 = vmatmul.f32.gmra.mxu3 %v1845_v23  ;;  %v1846_v45 = vsub.f32 %v1844_v46, %v1845_v23  ;;  %v1518_v46 = vadd.f32 %v1517_v47, %v1407_v57 }
 0x225   : > { %v4264_v34 = vand.u32 4294901760, %v1730_v2  ;;  %v1847_v51 = vand.u32 4294901760, %v1846_v45 }
 0x226   : > { %v1622_v61 = vpop.f32.mrf.mxu2  ;;  %v1711_v17 = vpop.f32.mrf.mxu3 }
 0x227   : > { %v1623_v38 = vadd.f32 %v1622_v61, %v1500_v25  ;;  %1848 = vmatmul.f32.gmra.mxu0 %v1847_v51  ;;  %2021 = vmatmul.f32.gmra.mxu1 %v4264_v34  ;;  %v1852_v54 = vsub.f32 %v1730_v2, %v4264_v34 }
 0x229   : > { %v1708_v60 = vadd.f32 %v1707_v11, %v1623_v38  ;;  %2131 = vmatmul.f32.gmra.mxu2 %v1852_v54  ;;  %v1853_v62 = vand.u32 4294901760, %v1852_v54 }
 0x22b   : > { %v1731_v22 = vmax.f32 %v1708_v60, 0.0  ;;  %2238 = vmatmul.f32.gmra.mxu3 %v1853_v62  ;;  %v1854_v6 = vsub.f32 %v1852_v54, %v1853_v62 }
 0x22d   : > { %v4271_v5 = vand.u32 4294901760, %v1731_v22  ;;  %v1855_v31 = vand.u32 4294901760, %v1854_v6 }
 0x22e   : > { %v1626_v8 = vpop.f32.mrf.mxu2  ;;  %v1715_v50 = vpop.f32.mrf.mxu3 }
 0x22f   : > { %v1627_v26 = vadd.f32 %v1626_v8, %v1506_v40  ;;  %1856 = vmatmul.f32.gmra.mxu0 %v1855_v31  ;;  %2025 = vmatmul.f32.gmra.mxu1 %v4271_v5  ;;  %v1860_v9 = vsub.f32 %v1731_v22, %v4271_v5 }
 0x231   : > { %v1712_v7 = vadd.f32 %v1711_v17, %v1627_v26  ;;  %2136 = vmatmul.f32.gmra.mxu2 %v1860_v9  ;;  %v1861_v4 = vand.u32 4294901760, %v1860_v9 }
 0x233   : > { %v1732_v48 = vmax.f32 %v1712_v7, 0.0  ;;  %2244 = vmatmul.f32.gmra.mxu3 %v1861_v4  ;;  %v1862_v56 = vsub.f32 %v1860_v9, %v1861_v4 }
 0x235   : > { %v4278_v15 = vand.u32 4294901760, %v1732_v48  ;;  %v1863_v39 = vand.u32 4294901760, %v1862_v56 }
 0x236   : > { %v1630_v59 = vpop.f32.mrf.mxu2  ;;  %v1719_v11 = vpop.f32.mrf.mxu3 }
 0x237   : > { %v1631_v41 = vadd.f32 %v1630_v59, %v1512_v44  ;;  %1864 = vmatmul.f32.gmra.mxu0 %v1863_v39  ;;  %2029 = vmatmul.f32.gmra.mxu1 %v4278_v15  ;;  %v1868_v1 = vsub.f32 %v1732_v48, %v4278_v15 }
 0x239   : > { %v1716_v53 = vadd.f32 %v1715_v50, %v1631_v41  ;;  %2141 = vmatmul.f32.gmra.mxu2 %v1868_v1  ;;  %v1869_v43 = vand.u32 4294901760, %v1868_v1 }
 0x23b   : > { %v1733_v21 = vmax.f32 %v1716_v53, 0.0  ;;  %2250 = vmatmul.f32.gmra.mxu3 %v1869_v43  ;;  %v1870_v58 = vsub.f32 %v1868_v1, %v1869_v43 }
 0x23d   : > { %v4282_v0 = vand.u32 4294901760, %v1733_v21  ;;  %v1871_v20 = vand.u32 4294901760, %v1870_v58 }
 0x23e   : > { %v1634_v16 = vpop.f32.mrf.mxu2 }
 0x23f   : > { %v1635_v23 = vadd.f32 %v1634_v16, %v1518_v46  ;;  %1872 = vmatmul.f32.gmra.mxu0 %v1871_v20  ;;  %2033 = vmatmul.f32.gmra.mxu1 %v4282_v0  ;;  %v1876_v63 = vsub.f32 %v1733_v21, %v4282_v0 }
 0x241   : > { %v1720_v2 = vadd.f32 %v1719_v11, %v1635_v23  ;;  %2146 = vmatmul.f32.gmra.mxu2 %v1876_v63  ;;  %v1877_v45 = vand.u32 4294901760, %v1876_v63 }
 0x243   : > { %v1734_v52 = vmax.f32 %v1720_v2, 0.0  ;;  %2256 = vmatmul.f32.gmra.mxu3 %v1877_v45  ;;  %v1878_v37 = vsub.f32 %v1876_v63, %v1877_v45 }
 0x245   : > { %v4286_v12 = vand.u32 4294901760, %v1734_v52  ;;  %v1879_v25 = vand.u32 4294901760, %v1878_v37 }
 0x247   : > { %1880 = vmatmul.f32.gmra.mxu0 %v1879_v25  ;;  %2037 = vmatmul.f32.gmra.mxu1 %v4286_v12  ;;  %v1884_v51 = vsub.f32 %v1734_v52, %v4286_v12 }
 0x249   : > { %2151 = vmatmul.f32.gmra.mxu2 %v1884_v51  ;;  %v1885_v61 = vand.u32 4294901760, %v1884_v51 }
 0x24b   : > { %2262 = vmatmul.f32.gmra.mxu3 %v1885_v61  ;;  %v1886_v38 = vsub.f32 %v1884_v51, %v1885_v61 }
 0x24d   : > { %v1887_v54 = vand.u32 4294901760, %v1886_v38 }
 0x24f   : > { %1888 = vmatmul.f32.gmra.mxu0 %v1887_v54  ;;  %2416 = vmatmul.f32.vlgmr.msra.gmra.mxu1 %v4207_v28 }
 0x257   : > { %2331 = vmatmul.f32.vlgmr.msra.gmra.mxu0 %v4207_v28  ;;  %2420 = vmatmul.f32.gmra.mxu1 %v4215_v19 }
 0x25f   : > { %2335 = vmatmul.f32.gmra.mxu0 %v4215_v19  ;;  %2424 = vmatmul.f32.gmra.mxu1 %v4222_v42  ;;  %v4309_v19 = vld [vmem:[#allocation2] ss:$0 sm:$0xff] }
 0x264   : > { %v4295_v10 = vpop.f32.mrf.mxu1 }
 0x267   : > { %2339 = vmatmul.f32.gmra.mxu0 %v4222_v42  ;;  %2428 = vmatmul.f32.gmra.mxu1 %v4229_v36 }
 0x26c   : > { %v4299_v18 = vpop.f32.mrf.mxu0  ;;  %v4301_v60 = vpop.f32.mrf.mxu1 }
 0x26d   : > { %v2092_v59 = vpop.f32.mrf.mxu2  ;;  %v1794_v20 = vadd.f32 %v4309_v19, %v4299_v18 }
 0x26f   : > { %2343 = vmatmul.f32.gmra.mxu0 %v4229_v36  ;;  %2432 = vmatmul.f32.gmra.mxu1 %v4236_v27  ;;  %v1991_v63 = vadd.f32 %v4295_v10, %v1794_v20 }
 0x271   : > { %v2093_v37 = vadd.f32 %v2092_v59, %v1991_v63 }
 0x274   : > { %v4305_v28 = vpop.f32.mrf.mxu0  ;;  %v1998_v62 = vpop.f32.mrf.mxu1 }
 0x275   : > { %v2097_v57 = vpop.f32.mrf.mxu2 }
 0x277   : > { %2347 = vmatmul.f32.gmra.mxu0 %v4236_v27  ;;  %2436 = vmatmul.f32.gmra.mxu1 %v4243_v14 }
 0x27c   : > { %v1809_v42 = vpop.f32.mrf.mxu0  ;;  %v2002_v32 = vpop.f32.mrf.mxu1 }
 0x27d   : > { %v1810_v22 = vadd.f32 %v4309_v19, %v1809_v42  ;;  %v2102_v23 = vpop.f32.mrf.mxu2 }
 0x27f   : > { %v4312_v6 = vadd.f32 %v1998_v62, %v1810_v22  ;;  %2351 = vmatmul.f32.gmra.mxu0 %v4243_v14  ;;  %2440 = vmatmul.f32.gmra.mxu1 %v4250_v30 }
 0x284   : > { %v1817_v36 = vpop.f32.mrf.mxu0  ;;  %v2006_v17 = vpop.f32.mrf.mxu1 }
 0x285   : > { %v1818_v55 = vadd.f32 %v4309_v19, %v1817_v36  ;;  %v2107_v38 = vpop.f32.mrf.mxu2 }
 0x287   : > { %v4317_v40 = vadd.f32 %v2002_v32, %v1818_v55  ;;  %2355 = vmatmul.f32.gmra.mxu0 %v4250_v30  ;;  %2444 = vmatmul.f32.gmra.mxu1 %v4257_v49 }
 0x28c   : > { %v1825_v27 = vpop.f32.mrf.mxu0  ;;  %v2010_v31 = vpop.f32.mrf.mxu1 }
 0x28d   : > { %v1826_v29 = vadd.f32 %v4309_v19, %v1825_v27  ;;  %v2112_v36 = vpop.f32.mrf.mxu2 }
 0x28f   : > { %v4322_v8 = vadd.f32 %v2006_v17, %v1826_v29  ;;  %2359 = vmatmul.f32.gmra.mxu0 %v4257_v49  ;;  %2448 = vmatmul.f32.gmra.mxu1 %v4264_v34  ;;  %v2103_v17 = vadd.f32 %v2102_v23, %v4312_v6 }
 0x294   : > { %v1833_v14 = vpop.f32.mrf.mxu0  ;;  %v2014_v26 = vpop.f32.mrf.mxu1 }
 0x295   : > { %v1834_v9 = vadd.f32 %v4309_v19, %v1833_v14 }
 0x297   : > { %v4327_v3 = vadd.f32 %v2010_v31, %v1834_v9  ;;  %2363 = vmatmul.f32.gmra.mxu0 %v4264_v34  ;;  %2452 = vmatmul.f32.gmra.mxu1 %v4271_v5  ;;  %v2108_v9 = vadd.f32 %v2107_v38, %v4317_v40 }
 0x29c   : > { %v1841_v30 = vpop.f32.mrf.mxu0  ;;  %v2018_v7 = vpop.f32.mrf.mxu1 }
 0x29d   : > { %v1842_v4 = vadd.f32 %v4309_v19, %v1841_v30  ;;  %v2117_v30 = vpop.f32.mrf.mxu2 }
 0x29f   : > { %v4332_v24 = vadd.f32 %v2014_v26, %v1842_v4  ;;  %2367 = vmatmul.f32.gmra.mxu0 %v4271_v5  ;;  %2456 = vmatmul.f32.gmra.mxu1 %v4278_v15 }
 0x2a4   : > { %v1849_v49 = vpop.f32.mrf.mxu0  ;;  %v2022_v33 = vpop.f32.mrf.mxu1 }
 0x2a5   : > { %v1850_v48 = vadd.f32 %v4309_v19, %v1849_v49 }
 0x2a7   : > { %v4337_v56 = vadd.f32 %v2018_v7, %v1850_v48  ;;  %2371 = vmatmul.f32.gmra.mxu0 %v4278_v15  ;;  %2460 = vmatmul.f32.gmra.mxu1 %v4282_v0  ;;  %v2191_v15 = vpop.f32.mrf.mxu3 }
 0x2a8   : > { %v2192_v51 = vadd.f32 %v2191_v15, %v2093_v37  ;;  %v2118_v15 = vadd.f32 %v2117_v30, %v4327_v3 }
 0x2ac   : > { %v1857_v34 = vpop.f32.mrf.mxu0  ;;  %v2026_v35 = vpop.f32.mrf.mxu1 }
 0x2ad   : > { %v1858_v44 = vadd.f32 %v4309_v19, %v1857_v34  ;;  %v2113_v34 = vadd.f32 %v2112_v36, %v4322_v8 }
 0x2af   : > { %v4342_v39 = vadd.f32 %v2022_v33, %v1858_v44  ;;  %2375 = vmatmul.f32.gmra.mxu0 %v4282_v0  ;;  %2464 = vmatmul.f32.gmra.mxu1 %v4286_v12  ;;  %v2197_v58 = vpop.f32.mrf.mxu3  ;;  %v2122_v44 = vpop.f32.mrf.mxu2 }
 0x2b4   : > { %v1865_v5 = vpop.f32.mrf.mxu0  ;;  %v2030_v50 = vpop.f32.mrf.mxu1 }
 0x2b5   : > { %v1866_v41 = vadd.f32 %v4309_v19, %v1865_v5 }
 0x2b7   : > { %v4347_v1 = vadd.f32 %v2026_v35, %v1866_v41  ;;  %2379 = vmatmul.f32.gmra.mxu0 %v4286_v12  ;;  %v2203_v45 = vpop.f32.mrf.mxu3  ;;  %v1802_v12 = vadd.f32 %v4309_v19, %v4305_v28 }
 0x2b8   : > { %v2204_v31 = vadd.f32 %v2203_v45, %v2103_v17 }
 0x2b9   : > { %v1995_v61 = vadd.f32 %v4301_v60, %v1802_v12 }
 0x2bb   : > { %v2098_v62 = vadd.f32 %v2097_v57, %v1995_v61 }
 0x2bc   : > { %v1873_v13 = vpop.f32.mrf.mxu0  ;;  %v2034_v53 = vpop.f32.mrf.mxu1 }
 0x2bd   : > { %v1874_v43 = vadd.f32 %v4309_v19, %v1873_v13  ;;  %v2198_v28 = vadd.f32 %v2197_v58, %v2098_v62 }
 0x2bf   : > { %v4351_v21 = vadd.f32 %v2030_v50, %v1874_v43  ;;  %v2209_v42 = vpop.f32.mrf.mxu3  ;;  %v2127_v43 = vpop.f32.mrf.mxu2 }
 0x2c0   : > { %v2210_v4 = vadd.f32 %v2209_v42, %v2108_v9 }
 0x2c4   : > { %v1881_v47 = vpop.f32.mrf.mxu0  ;;  %v2038_v0 = vpop.f32.mrf.mxu1 }
 0x2c5   : > { %v1882_v46 = vadd.f32 %v4309_v19, %v1881_v47  ;;  %v2123_v47 = vadd.f32 %v2122_v44, %v4332_v24 }
 0x2c7   : > { %v4356_v16 = vadd.f32 %v2034_v53, %v1882_v46  ;;  %v2215_v27 = vpop.f32.mrf.mxu3 }
 0x2c8   : > { %v2216_v5 = vadd.f32 %v2215_v27, %v2113_v34 }
 0x2cc   : > { %v1889_v11 = vpop.f32.mrf.mxu0  ;;  %v2417_v2 = vpop.f32.mrf.mxu1 }
 0x2cd   : > { %v1890_v52 = vadd.f32 %v4309_v19, %v1889_v11  ;;  %v2132_v11 = vpop.f32.mrf.mxu2 }
 0x2ce   : > { %v2133_v61 = vadd.f32 %v2132_v11, %v4342_v39 }
 0x2cf   : > { %v4362_v25 = vadd.f32 %v2038_v0, %v1890_v52  ;;  %v2221_v49 = vpop.f32.mrf.mxu3 }
 0x2d0   : > { %v2222_v53 = vadd.f32 %v2221_v49, %v2118_v15 }
 0x2d4   : > { %v2332_v54 = vpop.f32.mrf.mxu0  ;;  %v2421_v18 = vpop.f32.mrf.mxu1 }
 0x2d5   : > { %v2333_v10 = vadd.f32 %v2332_v54, %v2192_v51  ;;  %v2137_v54 = vpop.f32.mrf.mxu2 }
 0x2d6   : > { %v2138_v42 = vadd.f32 %v2137_v54, %v4347_v1 }
 0x2d7   : > { %v2418_v32 = vadd.f32 %v2417_v2, %v2333_v10  ;;  %v2227_v41 = vpop.f32.mrf.mxu3  ;;  %v2128_v2 = vadd.f32 %v2127_v43, %v4337_v56 }
 0x2d8   : > { %v2228_v20 = vadd.f32 %v2227_v41, %v2123_v47 }
 0x2d9   : > { %2469 = vst.msk [vmem:[%s4366_s18] sm:$0xff] %vm2468_vm1, %v2418_v32 }
 0x2dc   : > { %v2336_v19 = vpop.f32.mrf.mxu0  ;;  %v2425_v22 = vpop.f32.mrf.mxu1 }
 0x2dd   : > { %v2337_v60 = vadd.f32 %v2336_v19, %v2198_v28  ;;  %v2142_v19 = vpop.f32.mrf.mxu2 }
 0x2de   : > { %v2143_v17 = vadd.f32 %v2142_v19, %v4351_v21 }
 0x2df   : > { %v2422_v55 = vadd.f32 %v2421_v18, %v2337_v60  ;;  %v2233_v46 = vpop.f32.mrf.mxu3 }
 0x2e0   : > { %v2234_v37 = vadd.f32 %v2233_v46, %v2128_v2 }
 0x2e1   : > { %2470 = vst.msk [vmem:[%s4366_s18 + $0x8] sm:$0xff] %vm2468_vm1, %v2422_v55 }
 0x2e4   : > { %v2340_v29 = vpop.f32.mrf.mxu0  ;;  %v2429_v14 = vpop.f32.mrf.mxu1 }
 0x2e5   : > { %v2341_v26 = vadd.f32 %v2340_v29, %v2204_v31  ;;  %v2147_v29 = vpop.f32.mrf.mxu2 }
 0x2e7   : > { %v2426_v7 = vadd.f32 %v2425_v22, %v2341_v26  ;;  %v2239_v52 = vpop.f32.mrf.mxu3  ;;  %v2148_v26 = vadd.f32 %v2147_v29, %v4356_v16 }
 0x2e8   : > { %v2240_v18 = vadd.f32 %v2239_v52, %v2133_v61 }
 0x2e9   : > { %2471 = vst.msk [vmem:[%s4366_s18 + $0x10] sm:$0xff] %vm2468_vm1, %v2426_v7 }
 0x2ec   : > { %v2344_v33 = vpop.f32.mrf.mxu0  ;;  %v2433_v6 = vpop.f32.mrf.mxu1 }
 0x2ed   : > { %v2345_v48 = vadd.f32 %v2344_v33, %v2210_v4  ;;  %v2152_v33 = vpop.f32.mrf.mxu2 }
 0x2ef   : > { %v2430_v35 = vadd.f32 %v2429_v14, %v2345_v48  ;;  %v2245_v10 = vpop.f32.mrf.mxu3 }
 0x2f0   : > { %v2246_v22 = vadd.f32 %v2245_v10, %v2138_v42 }
 0x2f1   : > { %2472 = vst.msk [vmem:[%s4366_s18 + $0x18] sm:$0xff] %vm2468_vm1, %v2430_v35 }
 0x2f4   : > { %v2348_v50 = vpop.f32.mrf.mxu0  ;;  %v2437_v40 = vpop.f32.mrf.mxu1 }
 0x2f5   : > { %v2349_v59 = vadd.f32 %v2348_v50, %v2216_v5 }
 0x2f7   : > { %v2434_v13 = vadd.f32 %v2433_v6, %v2349_v59  ;;  %v2251_v60 = vpop.f32.mrf.mxu3  ;;  %v2153_v6 = vadd.f32 %v2152_v33, %v4362_v25 }
 0x2f8   : > { %v2252_v31 = vadd.f32 %v2251_v60, %v2143_v17 }
 0x2f9   : > { %2473 = vst.msk [vmem:[%s4366_s18 + $0x20] sm:$0xff] %vm2468_vm1, %v2434_v13 }
 0x2fc   : > { %v2352_v57 = vpop.f32.mrf.mxu0  ;;  %v2441_v8 = vpop.f32.mrf.mxu1 }
 0x2fd   : > { %v2353_v58 = vadd.f32 %v2352_v57, %v2222_v53 }
 0x2ff   : > { %v2438_v0 = vadd.f32 %v2437_v40, %v2353_v58  ;;  %v2257_v30 = vpop.f32.mrf.mxu3 }
 0x300   : > { %v2258_v7 = vadd.f32 %v2257_v30, %v2148_v26 }
 0x301   : > { %2474 = vst.msk [vmem:[%s4366_s18 + $0x28] sm:$0xff] %vm2468_vm1, %v2438_v0 }
 0x304   : > { %v2356_v23 = vpop.f32.mrf.mxu0  ;;  %v2445_v63 = vpop.f32.mrf.mxu1 }
 0x305   : > { %v2357_v3 = vadd.f32 %v2356_v23, %v2228_v20 }
 0x307   : > { %v2442_v45 = vadd.f32 %v2441_v8, %v2357_v3  ;;  %v2263_v34 = vpop.f32.mrf.mxu3 }
 0x308   : > { %v2264_v35 = vadd.f32 %v2263_v34, %v2153_v6 }
 0x309   : > { %2475 = vst.msk [vmem:[%s4366_s18 + $0x30] sm:$0xff] %vm2468_vm1, %v2442_v45 }
 0x30c   : > { %v2360_v12 = vpop.f32.mrf.mxu0  ;;  %v2449_v51 = vpop.f32.mrf.mxu1 }
 0x30d   : > { %v2361_v24 = vadd.f32 %v2360_v12, %v2234_v37 }
 0x30f   : > { %v2446_v38 = vadd.f32 %v2445_v63, %v2361_v24 }
 0x311   : > { %2476 = vst.msk [vmem:[%s4366_s18 + $0x38] sm:$0xff] %vm2468_vm1, %v2446_v38 }
 0x314   : > { %v2364_v62 = vpop.f32.mrf.mxu0  ;;  %v2453_v28 = vpop.f32.mrf.mxu1 }
 0x315   : > { %v2365_v56 = vadd.f32 %v2364_v62, %v2240_v18 }
 0x317   : > { %v2450_v32 = vadd.f32 %v2449_v51, %v2365_v56 }
 0x319   : > { %2477 = vst.msk [vmem:[%s4366_s18 + $0x40] sm:$0xff] %vm2468_vm1, %v2450_v32 }
 0x31c   : > { %v2368_v36 = vpop.f32.mrf.mxu0  ;;  %v2457_v27 = vpop.f32.mrf.mxu1 }
 0x31d   : > { %v2369_v39 = vadd.f32 %v2368_v36, %v2246_v22 }
 0x31f   : > { %v2454_v55 = vadd.f32 %v2453_v28, %v2369_v39 }
 0x321   : > { %2478 = vst.msk [vmem:[%s4366_s18 + $0x48] sm:$0xff] %vm2468_vm1, %v2454_v55 }
 0x324   : > { %v2372_v1 = vpop.f32.mrf.mxu0  ;;  %v2461_v4 = vpop.f32.mrf.mxu1 }
 0x325   : > { %v2373_v14 = vadd.f32 %v2372_v1, %v2252_v31 }
 0x327   : > { %v2458_v9 = vadd.f32 %v2457_v27, %v2373_v14 }
 0x329   : > { %2479 = vst.msk [vmem:[%s4366_s18 + $0x50] sm:$0xff] %vm2468_vm1, %v2458_v9 }
 0x32c   : > { %v2376_v49 = vpop.f32.mrf.mxu0  ;;  %v2465_v16 = vpop.f32.mrf.mxu1 }
 0x32d   : > { %v2377_v21 = vadd.f32 %v2376_v49, %v2258_v7 }
 0x32f   : > { %v2462_v48 = vadd.f32 %v2461_v4, %v2377_v21 }
 0x331   : > { %2480 = vst.msk [vmem:[%s4366_s18 + $0x58] sm:$0xff] %vm2468_vm1, %v2462_v48 }
 0x334   : > { %v2380_v44 = vpop.f32.mrf.mxu0 }
 0x335   : > { %v2381_v5 = vadd.f32 %v2380_v44, %v2264_v35  ;;  %2488 = sbr.rel (!%p3037_p4) target bundleno = 886 (0x376), region = 52 }
 0x337   : > { %v2466_v50 = vadd.f32 %v2465_v16, %v2381_v5 }
 0x339   : > { %2481 = vst.msk [vmem:[%s4366_s18 + $0x60] sm:$0xff] %vm2468_vm1, %v2466_v50 }
 0x33a   : > { %s4556_s26 = smov (!%p2491_p8, %s2490_s26), 13 }
 0x33b   : > { %s2753_s23 = sshll.u32 %s4556_s26, 3 }
 0x33c   : > { %p2756_p9 = scmp.eq.s32.totalorder %s2753_s23, 0 }
 0x33d   : > { %2875 = sdivrem.u32 (!%p2756_p9), %s4556_s26, 13 }
 0x33e   : > { %2499 = sbr.rel (%p2756_p9) target bundleno = 886 (0x376), region = 56 }
 0x346   : > { %s4418_s10 = spop.drf %2875 }
 0x347   : > { %s2877_s24 = spop.drf %2875  ;;  %p2757_p10 = scmp.le.s32.totalorder %s4418_s10, 0 }
 0x348   : > { %s4547_s6 = smov (!%p2757_p10), %s4412_s22  ;;  %s4548_s17 = smov (!%p2757_p10), %s4366_s18 }
 0x349   : > { %2704 = sbr.rel (%p2757_p10) target bundleno = 860 (0x35c), region = 132  ;;  %s4427_s25 = smov (!%p2757_p10), 0  }
 0x34a   : > { %s4429_s28 = smov (!%p2757_p10), 0  }
 0x34e LB: >> { %v2588_v25 = vld [vmem:[%s2943_s17] sm:$0xff]  ;;  %v2590_v40 = vld [vmem:[%s2943_s17 + $0x8] sm:$0xff]  ;;  %v2592_v59 = vld [vmem:[%s2943_s17 + $0x10] sm:$0xff]  ;;  %s2614_s30 = sadd.s32 1, %s2947_s25  ;;  %s2582_s28 = sadd.s32 1, %s2951_s28   ;;  %s2951_s28 = sphi %s4429_s28, %s2582_s28   ;;  %s2947_s25 = sphi %s4427_s25, %s4551_s25   ;;  %s2943_s17 = sphi %s4548_s17, %s4550_s17   ;;  %s2939_s6 = sphi %s4547_s6, %s4549_s6  }
 0x34f   : >> { %2589 = vst [vmem:[%s2939_s6] sm:$0xff] %v2588_v25  ;;  %v2594_v41 = vld [vmem:[%s2943_s17 + $0x18] sm:$0xff]  ;;  %p2615_p11 = scmp.ge.s32.totalorder %s2614_s30, %s4418_s10  ;;  %v2596_v15 = vld [vmem:[%s2943_s17 + $0x20] sm:$0xff]  ;;  %v2598_v13 = vld [vmem:[%s2943_s17 + $0x28] sm:$0xff]  ;;  %p2581_p12 = scmp.ge.s32.totalorder %s2582_s28, %s4418_s10 }
 0x350   : >> { %2591 = vst [vmem:[%s2939_s6 + $0x8] sm:$0xff] %v2590_v40  ;;  %v2600_v53 = vld [vmem:[%s2943_s17 + $0x30] sm:$0xff]  ;;  %v2602_v43 = vld [vmem:[%s2943_s17 + $0x38] sm:$0xff]  ;;  %v2604_v57 = vld [vmem:[%s2943_s17 + $0x40] sm:$0xff] }
 0x351   : >> { %2593 = vst [vmem:[%s2939_s6 + $0x10] sm:$0xff] %v2592_v59  ;;  %s4558_s30 = smov (%p2615_p11, %s2614_s30), 0  ;;  %v2606_v8 = vld [vmem:[%s2943_s17 + $0x48] sm:$0xff]  ;;  %v2608_v58 = vld [vmem:[%s2943_s17 + $0x50] sm:$0xff]  ;;  %v2610_v47 = vld [vmem:[%s2943_s17 + $0x58] sm:$0xff] }
 0x352   : >> { %2595 = vst [vmem:[%s2939_s6 + $0x18] sm:$0xff] %v2594_v41  ;;  %s2617_s8 = smul.u32 104, %s4558_s30  ;;  %v2612_v0 = vld [vmem:[%s2943_s17 + $0x60] sm:$0xff]  ;;  %s4551_s25 = smov %s4558_s30 }
 0x353   : >> { %2597 = vst [vmem:[%s2939_s6 + $0x20] sm:$0xff] %v2596_v15 }
 0x354   : >> { %2599 = vst [vmem:[%s2939_s6 + $0x28] sm:$0xff] %v2598_v13  ;;  %s2619_s11 = scalar_lea.vmem %s4366_s18, %s2617_s8 [#allocation3]   ;;  %s2620_s12 = scalar_lea.vmem %s4412_s22, %s2617_s8  }
 0x355   : >> { %2601 = vst [vmem:[%s2939_s6 + $0x30] sm:$0xff] %v2600_v53  ;;  %s4550_s17 = smov %s2619_s11 }
 0x356   : >> { %2603 = vst [vmem:[%s2939_s6 + $0x38] sm:$0xff] %v2602_v43 }
 0x357   : >> { %2605 = vst [vmem:[%s2939_s6 + $0x40] sm:$0xff] %v2604_v57  ;;  %2584 = sbr.rel (!%p2581_p12) target bundleno = 846 (0x34e), region = 138 }
 0x358   : >> { %2607 = vst [vmem:[%s2939_s6 + $0x48] sm:$0xff] %v2606_v8 }
 0x359   : >> { %2609 = vst [vmem:[%s2939_s6 + $0x50] sm:$0xff] %v2608_v58 }
 0x35a   : >> { %2611 = vst [vmem:[%s2939_s6 + $0x58] sm:$0xff] %v2610_v47 }
 0x35b   : >> { %2613 = vst [vmem:[%s2939_s6 + $0x60] sm:$0xff] %v2612_v0  ;;  %s4549_s6 = smov %s2620_s12 }
 0x35c PF: > { %2878 = sdivrem.u32 %s4556_s26, 13 }
 0x35d   : > { %s2758_s13 = smul.u32 104, %s4418_s10 }
 0x35f   : > { %s4483_s14 = scalar_lea.vmem %s4366_s18, %s2758_s13 [#allocation3]   ;;  %s2627_s15 = scalar_lea.vmem %s4412_s22, %s2758_s13  }
 0x365   : > { %s2879_s16 = spop.drf %2878 }
 0x366   : > { %s2880_s19 = spop.drf %2878 }
 0x367   : > { %p2760_p13 = scmp.le.s32.totalorder %s2880_s19, 0 }
 0x368   : > { %s2953_s20 = smov (!%p2760_p13), %s2627_s15   ;;  %s2957_s21 = smov (!%p2760_p13), %s4483_s14  }
 0x369   : > { %2718 = sbr.rel (%p2760_p13) target bundleno = 886 (0x376), region = 143  ;;  %s2961_s23 = smov (!%p2760_p13), 0  }
 0x36a   : > { %s2965_s24 = smov (!%p2760_p13), 0  }
 0x36e LB: >> { %v2637_v46 = vld [vmem:[%s2959_s21] sm:$0xff]  ;;  %s2639_s18 = sadd.s32 1, %s2963_s23  ;;  %s2631_s24 = sadd.s32 1, %s2967_s24   ;;  %s2967_s24 = sphi %s2965_s24, %s2631_s24   ;;  %s2963_s23 = sphi %s2961_s23, %s2962_s23   ;;  %s2959_s21 = sphi %s2957_s21, %s2644_s21   ;;  %s2955_s20 = sphi %s2953_s20, %s2645_s20  }
 0x36f   : >> { %2638 = vst [vmem:[%s2955_s20] sm:$0xff] %v2637_v46  ;;  %p2640_p0 = scmp.ge.s32.totalorder %s2639_s18, %s2880_s19  ;;  %p2630_p1 = scmp.ge.s32.totalorder %s2631_s24, %s2880_s19 }
 0x371   : >> { %s4560_s18 = smov (%p2640_p0, %s2639_s18), 0  ;;  %2633 = sbr.rel (!%p2630_p1) target bundleno = 878 (0x36e), region = 149 }
 0x372   : >> { %s2761_s26 = sshll.u32 %s4560_s18, 3  ;;  %s2962_s23 = smov %s4560_s18  }
 0x373   : >> { %s2644_s21 = scalar_lea.vmem %s4483_s14, %s2761_s26 [#allocation3]   ;;  %s2645_s20 = scalar_lea.vmem %s2627_s15, %s2761_s26  }
 0x376 PF: > { %p16_p2 = scmp.ge.s32.totalorder %s3027_s29, 4   ;;  %s4552_s26 = smov %s2931_s27 }
 0x377   : > { %s4553_s27 = smov %s3035_s9  ;;  %s4554_s28 = smov %s3027_s29 }
 0x378   :  { %18 = sbr.rel (!%p16_p2) target bundleno = 5 (0x5), region = 160 }

</bundles_post_ra>
